<compile_context>
chip_gen: v5e
topology: v5e:2x2
jax: 0.10.0
libtpu: 0.0.40
codegen_flags: <defaults>
</compile_context>

<pallas_src>
import functools

import jax
import jax.numpy as jnp
import numpy as np
from jax.experimental import pallas as pl
from jax.experimental.pallas import tpu as pltpu

NUM_CLASSES = 20
NUM_ANCHORS = 5
WIDTH_DIV = 16          # synthetic channel-width scale factor
LEAKY_SLOPE = 0.1
MAX_ROW_TILE = 512      # row-tile cap for the row-tiled matmul kernels
ROWS_TARGET = 512       # target B*TH*W rows per step for the 3x3 halo conv


def _round_up(x, m):
    return (x + m - 1) // m * m


def _cdiv(a, b):
    return (a + b - 1) // b


def _tile_rows(nr, max_tile=MAX_ROW_TILE, min_steps=4):
    """Row tile (multiple of 8) giving >= min_steps grid steps when possible."""
    tm = max(8, min(max_tile, _round_up(_cdiv(nr, min_steps), 8)))
    return tm, _round_up(nr, tm)


@functools.lru_cache(maxsize=None)
def _vmem_limit_bytes():
    try:
        cap = int(pltpu.get_tpu_info().vmem_capacity_bytes)
    except Exception:
        cap = 64 * 1024 * 1024
    return max(32 * 1024 * 1024, (cap * 3) // 4)


def _params(dims):
    return pltpu.CompilerParams(dimension_semantics=dims,
                                vmem_limit_bytes=_vmem_limit_bytes())


@functools.lru_cache(maxsize=None)
def _buffered_ok():
    """Probe whether pl.Buffered(1) (single-buffered resident operands) works."""
    try:
        def k(x_ref, o_ref):
            o_ref[...] = x_ref[...] + 1.0

        x = jnp.zeros((8, 128), jnp.float32)
        out = pl.pallas_call(
            k,
            out_shape=jax.ShapeDtypeStruct((8, 128), jnp.float32),
            grid=(1,),
            in_specs=[pl.BlockSpec((8, 128), lambda i: (0, 0),
                                   pipeline_mode=pl.Buffered(1))],
            out_specs=pl.BlockSpec((8, 128), lambda i: (0, 0)),
        )(x)
        return bool(jnp.allclose(out, x + 1.0))
    except Exception:
        return False


def _resident_spec(block_shape, index_map):
    """BlockSpec for grid-invariant operands (weights / scale / bias).

    Single-buffered when supported so large resident weights are not
    pointlessly double-buffered (keeps wide-K layers inside v7x VMEM)."""
    if _buffered_ok():
        return pl.BlockSpec(block_shape, index_map, pipeline_mode=pl.Buffered(1))
    return pl.BlockSpec(block_shape, index_map)


# ---------------------------------------------------------------------------
# Pallas kernels
# ---------------------------------------------------------------------------
def _matmul_bn_act_kernel(x_ref, w_ref, s_ref, b_ref, o_ref, *, act):
    """Row-tiled matmul + folded-BN + activation (1x1 convs / im2col fallback)."""
    y = jnp.dot(x_ref[...], w_ref[...], preferred_element_type=jnp.float32)
    y = y * s_ref[...] + b_ref[...]
    if act == "relu":
        y = jnp.maximum(y, 0.0)
    else:
        y = jnp.where(y > 0.0, y, LEAKY_SLOPE * y)
    o_ref[...] = y.astype(o_ref.dtype)


def _conv3x3_halo_kernel(xp_ref, w_ref, s_ref, b_ref, o_ref, xbuf, sem,
                         *, act, th, out_w):
    """3x3 SAME conv without im2col.

    xp_ref : (B, Hp+2, W+2, Cin) bf16 padded input, raw HBM (pl.ANY)
    w_ref  : (9, Cin, Cout)      bf16 resident weights (tap-major)
    s_ref, b_ref : (1, Cout)     f32 folded BN scale / bias
    o_ref  : (B, th, W, Cout)    bf16 output block (rows [t*th, t*th+th))
    xbuf   : (2, B, th+2, W+2, Cin) VMEM double buffer; sem: DMA((2,))
    """
    t = pl.program_id(0)
    nt = pl.num_programs(0)
    halo = th + 2

    def copy(step, slot):
        return pltpu.make_async_copy(
            xp_ref.at[:, pl.ds(step * th, halo)], xbuf.at[slot], sem.at[slot])

    @pl.when(t == 0)
    def _():
        copy(0, 0).start()

    @pl.when(t + 1 < nt)
    def _():
        copy(t + 1, (t + 1) % 2).start()

    copy(t, t % 2).wait()

    x = xbuf[t % 2]                        # (B, th+2, W+2, Cin)
    bsz, _, _, cin = x.shape
    cout = o_ref.shape[-1]
    rows = bsz * th * out_w

    y = None
    for dy in range(3):
        for dx in range(3):
            tap = x[:, dy:dy + th, dx:dx + out_w, :].reshape(rows, cin)
            d = jnp.dot(tap, w_ref[dy * 3 + dx],
                        preferred_element_type=jnp.float32)
            y = d if y is None else y + d

    y = y * s_ref[...] + b_ref[...]
    if act == "relu":
        y = jnp.maximum(y, 0.0)
    else:
        y = jnp.where(y > 0.0, y, LEAKY_SLOPE * y)
    o_ref[...] = y.reshape(bsz, th, out_w, cout).astype(o_ref.dtype)


def _maxpool_kernel(x_ref, o_ref, *, C):
    """2x2/stride-2 max pool on a (1, TH, 2, Wo, 2C) window view."""
    t = x_ref[...]
    v = jnp.maximum(t[:, :, 0], t[:, :, 1])          # vertical (row-pair) max
    o_ref[...] = jnp.maximum(v[..., :C], v[..., C:])  # horizontal (col-pair) max


def _head_kernel(x_ref, w_ref, b_ref, o_ref, *, num_anchors, num_classes):
    """Fused 1x1 detection conv + YOLO head; one lane-dense (TM,128) output.

    Weight columns are pre-permuted to [classes(A*nc) | xy(2A) | hw(2A) |
    conf(A) | pad], so the epilogue is lane-masked sigmoid/exp plus per-anchor
    softmax over contiguous 20-lane groups.
    """
    A, nc = num_anchors, num_classes
    ncA = A * nc
    z = jnp.dot(x_ref[...], w_ref[...], preferred_element_type=jnp.float32)
    z = z + b_ref[...]
    lane = jax.lax.broadcasted_iota(jnp.int32, z.shape, 1)
    sig = 1.0 / (1.0 + jnp.exp(-z))
    ex = jnp.exp(z)
    is_hw = (lane >= ncA + 2 * A) & (lane < ncA + 4 * A)
    boxconf = jnp.where(is_hw, ex, sig)

    probs = []
    for a in range(A):
        s = z[:, a * nc:(a + 1) * nc]
        m = jnp.max(s, axis=-1, keepdims=True)
        e = jnp.exp(s - m)
        # exact divide (pl.reciprocal(approx=True) would loosen the check)
        probs.append(e / jnp.sum(e, axis=-1, keepdims=True))
    cls = jnp.concatenate(probs, axis=-1)             # (TM, ncA)
    o_ref[...] = jnp.concatenate([cls, boxconf[:, ncA:]], axis=-1)


# ---------------------------------------------------------------------------
# Layer wrappers
# ---------------------------------------------------------------------------
def _rows_matmul_bn_act(rows, w2d, scale, bias, *, act,
                        out_dtype=jnp.bfloat16):
    nr, k = rows.shape
    cout = w2d.shape[-1]
    tm, nrp = _tile_rows(nr)
    if nrp != nr:
        rows = jnp.pad(rows, ((0, nrp - nr), (0, 0)))
    out = pl.pallas_call(
        functools.partial(_matmul_bn_act_kernel, act=act),
        out_shape=jax.ShapeDtypeStruct((nrp, cout), out_dtype),
        grid_spec=pltpu.PrefetchScalarGridSpec(
            num_scalar_prefetch=0,
            grid=(nrp // tm,),
            in_specs=[
                pl.BlockSpec((tm, k), lambda m: (m, 0)),
                _resident_spec((k, cout), lambda m: (0, 0)),
                _resident_spec((1, cout), lambda m: (0, 0)),
                _resident_spec((1, cout), lambda m: (0, 0)),
            ],
            out_specs=pl.BlockSpec((tm, cout), lambda m: (m, 0))),
        compiler_params=_params(("parallel",)),
    )(rows, w2d,
      scale.reshape(1, cout).astype(jnp.float32),
      bias.reshape(1, cout).astype(jnp.float32))
    return out[:nr]


def conv1x1_bn_act(x, w, scale, bias, *, act):
    B, H, W, Cin = x.shape
    Cout = w.shape[-1]
    rows = x.astype(jnp.bfloat16).reshape(B * H * W, Cin)
    out = _rows_matmul_bn_act(rows, w.reshape(Cin, Cout).astype(jnp.bfloat16),
                              scale, bias, act=act)
    return out.reshape(B, H, W, Cout)


def _conv3x3_halo(x, w, scale, bias, *, act):
    B, H, W, Cin = x.shape
    Cout = w.shape[-1]
    th = max(1, min(H, ROWS_TARGET // max(1, B * W)))
    if H > 1:
        th = min(th, (H + 1) // 2)       # >= 2 grid steps -> DMA/compute overlap
    Hp = _round_up(H, th)
    nt = Hp // th

    xp = jnp.pad(x.astype(jnp.bfloat16),
                 ((0, 0), (1, 1 + Hp - H), (1, 1), (0, 0)))
    w9 = w.reshape(9, Cin, Cout).astype(jnp.bfloat16)

    out = pl.pallas_call(
        functools.partial(_conv3x3_halo_kernel, act=act, th=th, out_w=W),
        out_shape=jax.ShapeDtypeStruct((B, Hp, W, Cout), jnp.bfloat16),
        grid_spec=pltpu.PrefetchScalarGridSpec(
            num_scalar_prefetch=0,
            grid=(nt,),
            in_specs=[
                pl.BlockSpec(memory_space=pl.ANY),   # raw HBM, manual halo DMA
                _resident_spec((9, Cin, Cout), lambda t: (0, 0, 0)),
                _resident_spec((1, Cout), lambda t: (0, 0)),
                _resident_spec((1, Cout), lambda t: (0, 0)),
            ],
            out_specs=pl.BlockSpec((B, th, W, Cout), lambda t: (0, t, 0, 0)),
            scratch_shapes=[
                pltpu.VMEM((2, B, th + 2, W + 2, Cin), jnp.bfloat16),
                pltpu.SemaphoreType.DMA((2,)),
            ]),
        # "arbitrary": the t==0 DMA priming requires sequential execution.
        compiler_params=_params(("arbitrary",)),
    )(xp, w9,
      scale.reshape(1, Cout).astype(jnp.float32),
      bias.reshape(1, Cout).astype(jnp.float32))
    return out[:, :H] if Hp != H else out


def _conv3x3_im2col(x, w, scale, bias, *, act):
    """Fallback path (materialized im2col + row-tiled matmul)."""
    B, H, W, Cin = x.shape
    Cout = w.shape[-1]
    xb = jnp.pad(x.astype(jnp.bfloat16), ((0, 0), (1, 1), (1, 1), (0, 0)))
    cols = [xb[:, dy:dy + H, dx:dx + W, :] for dy in range(3) for dx in range(3)]
    rows = jnp.concatenate(cols, axis=-1).reshape(B * H * W, 9 * Cin)
    out = _rows_matmul_bn_act(
        rows, w.reshape(9 * Cin, Cout).astype(jnp.bfloat16), scale, bias, act=act)
    return out.reshape(B, H, W, Cout)


def conv_bn_act(x, w, scale, bias, *, act):
    if w.shape[0] == 1 and w.shape[1] == 1:
        return conv1x1_bn_act(x, w, scale, bias, act=act)
    try:
        return _conv3x3_halo(x, w, scale, bias, act=act)
    except Exception:
        # TODO(synk): drop this im2col fallback once the halo-DMA path is
        # validated on every deployed toolchain.
        return _conv3x3_im2col(x, w, scale, bias, act=act)


def _largest_divisor_leq(n, cap):
    for d in range(max(1, min(n, cap)), 0, -1):
        if n % d == 0:
            return d
    return 1


def maxpool2x2(x):
    """2x2 / stride-2 max pool; input read through a zero-copy window view."""
    B, H, W, C = x.shape
    Ho, Wo = H // 2, W // 2
    xv = x.reshape(B, Ho, 2, Wo, 2 * C)          # zero-copy, no host slicing
    row_bytes = 2 * Wo * 2 * C * x.dtype.itemsize
    th = _largest_divisor_leq(Ho, max(1, (1 << 20) // max(1, row_bytes)))
    return pl.pallas_call(
        functools.partial(_maxpool_kernel, C=C),
        out_shape=jax.ShapeDtypeStruct((B, Ho, Wo, C), x.dtype),
        grid_spec=pltpu.PrefetchScalarGridSpec(
            num_scalar_prefetch=0,
            grid=(B, Ho // th),
            in_specs=[pl.BlockSpec((1, th, 2, Wo, 2 * C),
                                   lambda b, t: (b, t, 0, 0, 0))],
            out_specs=pl.BlockSpec((1, th, Wo, C), lambda b, t: (b, t, 0, 0))),
        compiler_params=_params(("parallel", "parallel")),
    )(xv)


def reorg_nhwc(x, stride=2):
    """ReorgLayer (pure data movement).  Matches the PyTorch NCHW ReorgLayer:
    out channel = (hs_off*stride + ws_off)*C + c."""
    B, H, W, C = x.shape
    x = x.reshape(B, H // stride, stride, W // stride, stride, C)
    x = x.transpose(0, 1, 3, 2, 4, 5)
    return x.reshape(B, H // stride, W // stride, stride * stride * C)


def conv1x1_head(x, w, bias, num_anchors, num_classes):
    """Fused 1x1 detection conv + YOLO head (sigmoid / exp / softmax)."""
    B, H, W, Cin = x.shape
    A, nc = num_anchors, num_classes
    K = 5 + nc
    Cout = K * A                    # 125
    Cpad = _round_up(Cout, 128)     # 128 -> lane-dense MXU tile / store
    ncA = A * nc

    # Column permutation: [classes (anchor-major) | xy | hw | conf]
    perm = []
    for a in range(A):
        perm += [a * K + 5 + c for c in range(nc)]
    for a in range(A):
        perm += [a * K + 0, a * K + 1]
    for a in range(A):
        perm += [a * K + 2, a * K + 3]
    for a in range(A):
        perm += [a * K + 4]
    perm = np.asarray(perm, np.int32)

    NR = B * H * W
    xb = x.astype(jnp.bfloat16).reshape(NR, Cin)
    TM, NRp = _tile_rows(NR)
    if NRp != NR:
        xb = jnp.pad(xb, ((0, NRp - NR), (0, 0)))
    w2 = w.reshape(Cin, Cout)[:, perm]
    w2 = jnp.pad(w2, ((0, 0), (0, Cpad - Cout))).astype(jnp.bfloat16)
    b2 = jnp.pad(bias[perm], (0, Cpad - Cout)).reshape(1, Cpad).astype(jnp.float32)

    out = pl.pallas_call(
        functools.partial(_head_kernel, num_anchors=A, num_classes=nc),
        out_shape=jax.ShapeDtypeStruct((NRp, Cpad), jnp.float32),
        grid_spec=pltpu.PrefetchScalarGridSpec(
            num_scalar_prefetch=0,
            grid=(NRp // TM,),
            in_specs=[
                pl.BlockSpec((TM, Cin), lambda m: (m, 0)),
                _resident_spec((Cin, Cpad), lambda m: (0, 0)),
                _resident_spec((1, Cpad), lambda m: (0, 0)),
            ],
            out_specs=pl.BlockSpec((TM, Cpad), lambda m: (m, 0))),
        compiler_params=_params(("parallel",)),
    )(xb, w2, b2)

    out = out[:NR]
    M = H * W
    cls = out[:, :ncA].reshape(B, M, A, nc).reshape(B, M * A, nc)
    xy = out[:, ncA:ncA + 2 * A].reshape(B, M, A, 2)
    hw = out[:, ncA + 2 * A:ncA + 4 * A].reshape(B, M, A, 2)
    conf = out[:, ncA + 4 * A:ncA + 5 * A].reshape(B, M, A, 1).reshape(B, M * A, 1)
    delta = jnp.concatenate([xy, hw], axis=-1).reshape(B, M * A, 4)
    return delta, conf, cls


# ---------------------------------------------------------------------------
# Model (deterministic synthetic parameters)
# ---------------------------------------------------------------------------
def _conv_bn_params(key, kh, kw, cin, cout):
    kw_, ks, kb = jax.random.split(key, 3)
    w = jax.random.normal(kw_, (kh, kw, cin, cout), jnp.float32) / np.sqrt(kh * kw * cin)
    scale = 1.0 + 0.05 * jax.random.normal(ks, (cout,), jnp.float32)
    bias = 0.05 * jax.random.normal(kb, (cout,), jnp.float32)
    return w, scale, bias


class Yolov2Pallas:
    num_classes = NUM_CLASSES
    num_anchors = NUM_ANCHORS

    def __init__(self, key, width_div=WIDTH_DIV):
        d = width_div
        # vgg16_bn .features[:-1]  (last MaxPool removed)
        vgg_cfg = [64, 64, "M", 128, 128, "M", 256, 256, 256, "M",
                   512, 512, 512, "M", 512, 512, 512]
        keys = iter(jax.random.split(key, 64))

        self.conv1 = []
        cin = 3
        for v in vgg_cfg:
            if v == "M":
                self.conv1.append("M")
            else:
                cout = max(v // d, 1)
                self.conv1.append(_conv_bn_params(next(keys), 3, 3, cin, cout))
                cin = cout

        c512 = max(512 // d, 1)
        c1024 = max(1024 // d, 1)
        c64 = max(64 // d, 1)

        self.downsampler = _conv_bn_params(next(keys), 1, 1, c512, c64)
        self.conv3a = _conv_bn_params(next(keys), 3, 3, c512, c1024)
        self.conv3b = _conv_bn_params(next(keys), 3, 3, c1024, c1024)

        c_cat = 4 * c64 + c1024                       # "1280" after width scaling
        self.conv4a = _conv_bn_params(next(keys), 3, 3, c_cat, c1024)

        c_out = (5 + self.num_classes) * self.num_anchors   # 125, kept exact
        kw_, kb_ = jax.random.split(next(keys))
        w4b = jax.random.normal(kw_, (1, 1, c1024, c_out), jnp.float32) / np.sqrt(c1024)
        b4b = 0.05 * jax.random.normal(kb_, (c_out,), jnp.float32)
        self.conv4b = (w4b, b4b)                      # plain Conv2d (no BN) + head

    def __call__(self, x_nchw):
        x = jnp.transpose(x_nchw, (0, 2, 3, 1))       # NCHW -> NHWC
        for layer in self.conv1:
            if isinstance(layer, str):
                x = maxpool2x2(x)
            else:
                w, s, b = layer
                x = conv_bn_act(x, w, s, b, act="relu")
        # shortcut branch
        sc = conv_bn_act(x, *self.downsampler, act="leaky")
        sc = reorg_nhwc(sc, 2)
        # main branch (conv3)
        y = maxpool2x2(x)
        y = conv_bn_act(y, *self.conv3a, act="leaky")
        y = conv_bn_act(y, *self.conv3b, act="leaky")
        # torch.cat([shortcut, x], dim=1) -> channel concat in NHWC
        y = jnp.concatenate([sc, y], axis=-1)
        # conv4 + fused detection head
        y = conv_bn_act(y, *self.conv4a, act="leaky")
        w4b, b4b = self.conv4b
        return conv1x1_head(y, w4b, b4b, self.num_anchors, self.num_classes)


# ---------------------------------------------------------------------------
# Pure-JAX reference (correctness check; same bf16-operand math)
# ---------------------------------------------------------------------------
def _ref_conv(x, w, scale, bias, act):
    y = jax.lax.conv_general_dilated(
        x.astype(jnp.bfloat16), w.astype(jnp.bfloat16),
        window_strides=(1, 1), padding="SAME",
        dimension_numbers=("NHWC", "HWIO", "NHWC"),
        preferred_element_type=jnp.float32)
    y = y * scale + bias
    if act == "relu":
        y = jnp.maximum(y, 0.0)
    else:
        y = jnp.where(y > 0.0, y, LEAKY_SLOPE * y)
    return y


def _ref_pool(x):
    B, H, W, C = x.shape
    return x.reshape(B, H // 2, 2, W // 2, 2, C).max(axis=(2, 4))


def reference_forward(model, x_nchw):
    x = jnp.transpose(x_nchw, (0, 2, 3, 1))
    for layer in model.conv1:
        if isinstance(layer, str):
            x = _ref_pool(x)
        else:
            x = _ref_conv(x, *layer, "relu")
    sc = reorg_nhwc(_ref_conv(x, *model.downsampler, "leaky"), 2)
    y = _ref_pool(x)
    y = _ref_conv(y, *model.conv3a, "leaky")
    y = _ref_conv(y, *model.conv3b, "leaky")
    y = jnp.concatenate([sc, y], axis=-1)
    y = _ref_conv(y, *model.conv4a, "leaky")
    w4b, b4b = model.conv4b
    out = jax.lax.conv_general_dilated(
        y.astype(jnp.bfloat16), w4b.astype(jnp.bfloat16),
        window_strides=(1, 1), padding="SAME",
        dimension_numbers=("NHWC", "HWIO", "NHWC"),
        preferred_element_type=jnp.float32) + b4b
    B, H, W, _ = out.shape
    o = out.reshape(B, H * W * model.num_anchors, 5 + model.num_classes)
    xy = jax.nn.sigmoid(o[..., 0:2])
    hw = jnp.exp(o[..., 2:4])
    conf = jax.nn.sigmoid(o[..., 4:5])
    probs = jax.nn.softmax(o[..., 5:], axis=-1)
    return jnp.concatenate([xy, hw], axis=-1), conf, probs


# ---------------------------------------------------------------------------
if __name__ == "__main__":
    root = jax.random.PRNGKey(0)
    k_params, k_input = jax.random.split(root)

    model = Yolov2Pallas(k_params)

    # PyTorch-style NCHW input: (batch=2, channels=3, H=64, W=64).
    x = jax.random.normal(k_input, (2, 3, 64, 64), jnp.float32)

    delta_pred, conf_pred, class_pred = model(x)
    jax.block_until_ready((delta_pred, conf_pred, class_pred))

    # h = w = 64/32 = 2  ->  boxes = h*w*num_anchors = 20
    assert delta_pred.shape == (2, 20, 4)
    assert conf_pred.shape == (2, 20, 1)
    assert class_pred.shape == (2, 20, 20)

    d_ref, c_ref, p_ref = reference_forward(model, x)
    np.testing.assert_allclose(np.asarray(delta_pred), np.asarray(d_ref),
                               rtol=5e-3, atol=1e-3)
    np.testing.assert_allclose(np.asarray(conf_pred), np.asarray(c_ref),
                               rtol=5e-3, atol=1e-3)
    np.testing.assert_allclose(np.asarray(class_pred), np.asarray(p_ref),
                               rtol=5e-3, atol=1e-3)

    print("KERNEL_OK")
</pallas_src>

<mosaic_0001>
module attributes {stable_mosaic.version = 11 : i64} {
  func.func @k(%arg0: i32, %arg1: memref<8x128xf32, #tpu.memory_space<vmem>>, %arg2: memref<8x128xf32, #tpu.memory_space<vmem>>) attributes {dimension_semantics = [#tpu.dimension_semantics<arbitrary>], iteration_bounds = array<i64: 1>, scalar_prefetch = 0 : i64, scratch_operands = 0 : i64, tpu.core_type = #tpu.core_type<tc>, window_params = [{pipeline_mode = #tpu.pipeline_mode<synchronous>, transform_indices = @transform_0, window_bounds = array<i64: 8, 128>}, {pipeline_mode = #tpu.pipeline_mode<synchronous>, transform_indices = @transform_1, window_bounds = array<i64: 8, 128>}]} {
    %c0 = arith.constant 0 : index
    %c0_0 = arith.constant 0 : index
    %0 = vector.load %arg1[%c0, %c0_0] : memref<8x128xf32, #tpu.memory_space<vmem>>, vector<8x128xf32>
    %cst = arith.constant 1.000000e+00 : f32
    %1 = vector.broadcast %cst : f32 to vector<8x128xf32>
    %2 = arith.addf %0, %1 : vector<8x128xf32>
    %c0_1 = arith.constant 0 : index
    %c0_2 = arith.constant 0 : index
    %3 = vector.load %arg2[%c0_1, %c0_2] : memref<8x128xf32, #tpu.memory_space<vmem>>, vector<8x128xf32>
    tpu.vector_store %arg2[%c0_1, %c0_2], %2 {strides = array<i32>} : memref<8x128xf32, #tpu.memory_space<vmem>>, vector<8x128xf32>,
    return
  }
  func.func @transform_0(%arg0: i32) -> (i32, i32) {
    %c0_i32 = arith.constant 0 : i32
    %c0_i32_0 = arith.constant 0 : i32
    %c0_i32_1 = arith.constant 0 : i32
    return %c0_i32, %c0_i32_0 : i32, i32
  }
  func.func @transform_1(%arg0: i32) -> (i32, i32) {
    %c0_i32 = arith.constant 0 : i32
    %c0_i32_0 = arith.constant 0 : i32
    %c0_i32_1 = arith.constant 0 : i32
    return %c0_i32, %c0_i32_0 : i32, i32
  }
}

module attributes {stable_mosaic.version = 11 : i64} {
  func.func @_conv3x3_halo_kernel(%arg0: i32, %arg1: memref<2x66x66x3xbf16, #tpu.memory_space<any>>, %arg2: memref<9x3x4xbf16, #tpu.memory_space<vmem>>, %arg3: memref<1x4xf32, #tpu.memory_space<vmem>>, %arg4: memref<1x4xf32, #tpu.memory_space<vmem>>, %arg5: memref<2x4x64x4xbf16, #tpu.memory_space<vmem>>, %arg6: memref<2x2x6x66x3xbf16, #tpu.memory_space<vmem>>, %arg7: memref<2x!tpu.dma_semaphore, #tpu.memory_space<semaphore_mem>>) attributes {dimension_semantics = [#tpu.dimension_semantics<arbitrary>], iteration_bounds = array<i64: 16>, scalar_prefetch = 0 : i64, scratch_operands = 2 : i64, tpu.core_type = #tpu.core_type<tc>, window_params = [{}, {pipeline_mode = #tpu.pipeline_mode<synchronous>, transform_indices = @transform_1, window_bounds = array<i64: 9, 3, 4>}, {pipeline_mode = #tpu.pipeline_mode<synchronous>, transform_indices = @transform_2, window_bounds = array<i64: 1, 4>}, {pipeline_mode = #tpu.pipeline_mode<synchronous>, transform_indices = @transform_3, window_bounds = array<i64: 1, 4>}, {transform_indices = @transform_4, window_bounds = array<i64: 2, 4, 64, 4>}]} {
    %c0_i32 = arith.constant 0 : i32
    %0 = arith.cmpi eq, %arg0, %c0_i32 : i32
    %1 = arith.extui %0 : i1 to i32
    %c0_i32_0 = arith.constant 0 : i32
    %2 = arith.cmpi ne, %1, %c0_i32_0 : i32
    scf.if %2 {
      %c0_i32_59 = arith.constant 0 : i32
      %c0_i32_60 = arith.constant 0 : i32
      %c0_i32_61 = arith.constant 0 : i32
      %c0_i32_62 = arith.constant 0 : i32
      %c0_i32_63 = arith.constant 0 : i32
      %c0_i32_64 = arith.constant 0 : i32
      %100 = tpu.memref_slice %arg1[%c0_i32_61, %c0_i32_62, %c0_i32_63, %c0_i32_64] : memref<2x66x66x3xbf16, #tpu.memory_space<any>> -> memref<2x6x66x3xbf16, #tpu.memory_space<any>>
      %c0_i32_65 = arith.constant 0 : i32
      %c0_i32_66 = arith.constant 0 : i32
      %c0_i32_67 = arith.constant 0 : i32
      %c0_i32_68 = arith.constant 0 : i32
      %101 = tpu.memref_slice %arg6[%c0_i32_59, %c0_i32_65, %c0_i32_66, %c0_i32_67, %c0_i32_68] : memref<2x2x6x66x3xbf16, #tpu.memory_space<vmem>> -> memref<1x2x6x66x3xbf16, #tpu.memory_space<vmem>>
      %102 = tpu.memref_squeeze %101 : memref<1x2x6x66x3xbf16, #tpu.memory_space<vmem>> -> memref<2x6x66x3xbf16, #tpu.memory_space<vmem>>
      %103 = tpu.memref_slice %arg7[%c0_i32_60] : memref<2x!tpu.dma_semaphore, #tpu.memory_space<semaphore_mem>> -> memref<1x!tpu.dma_semaphore, #tpu.memory_space<semaphore_mem>>
      %104 = tpu.memref_squeeze %103 : memref<1x!tpu.dma_semaphore, #tpu.memory_space<semaphore_mem>> -> memref<!tpu.dma_semaphore, #tpu.memory_space<semaphore_mem>>
      tpu.enqueue_dma source(%100 : memref<2x6x66x3xbf16, #tpu.memory_space<any>>) target(%102 : memref<2x6x66x3xbf16, #tpu.memory_space<vmem>>) target_semaphore(%104 : memref<!tpu.dma_semaphore, #tpu.memory_space<semaphore_mem>>)
    } else {
    }
    %c1_i32 = arith.constant 1 : i32
    %3 = arith.addi %arg0, %c1_i32 : i32
    %c16_i32 = arith.constant 16 : i32
    %4 = arith.cmpi slt, %3, %c16_i32 : i32
    %5 = arith.extui %4 : i1 to i32
    %c0_i32_1 = arith.constant 0 : i32
    %6 = arith.cmpi ne, %5, %c0_i32_1 : i32
    scf.if %6 {
      %c1_i32_59 = arith.constant 1 : i32
      %100 = arith.addi %arg0, %c1_i32_59 : i32
      %c1_i32_60 = arith.constant 1 : i32
      %101 = arith.addi %arg0, %c1_i32_60 : i32
      %c2_i32_61 = arith.constant 2 : i32
      %c0_i32_62 = arith.constant 0 : i32
      %102 = arith.cmpi eq, %c2_i32_61, %c0_i32_62 : i32
      %c1_i32_63 = arith.constant 1 : i32
      %103 = arith.select %102, %c1_i32_63, %c2_i32_61 : i32
      %104 = arith.remsi %101, %103 : i32
      %c0_i32_64 = arith.constant 0 : i32
      %105 = arith.cmpi ne, %104, %c0_i32_64 : i32
      %c0_i32_65 = arith.constant 0 : i32
      %106 = arith.cmpi slt, %104, %c0_i32_65 : i32
      %c0_i32_66 = arith.constant 0 : i32
      %107 = arith.cmpi slt, %103, %c0_i32_66 : i32
      %108 = arith.xori %106, %107 : i1
      %109 = arith.andi %108, %105 : i1
      %110 = arith.addi %104, %103 : i32
      %111 = arith.select %109, %110, %104 : i32
      %c4_i32_67 = arith.constant 4 : i32
      %112 = arith.muli %100, %c4_i32_67 : i32
      %c0_i32_68 = arith.constant 0 : i32
      %c0_i32_69 = arith.constant 0 : i32
      %c0_i32_70 = arith.constant 0 : i32
      %113 = tpu.memref_slice %arg1[%c0_i32_68, %112, %c0_i32_69, %c0_i32_70] : memref<2x66x66x3xbf16, #tpu.memory_space<any>> -> memref<2x6x66x3xbf16, #tpu.memory_space<any>>
      %c0_i32_71 = arith.constant 0 : i32
      %c0_i32_72 = arith.constant 0 : i32
      %c0_i32_73 = arith.constant 0 : i32
      %c0_i32_74 = arith.constant 0 : i32
      %114 = tpu.memref_slice %arg6[%111, %c0_i32_71, %c0_i32_72, %c0_i32_73, %c0_i32_74] : memref<2x2x6x66x3xbf16, #tpu.memory_space<vmem>> -> memref<1x2x6x66x3xbf16, #tpu.memory_space<vmem>>
      %115 = tpu.memref_squeeze %114 : memref<1x2x6x66x3xbf16, #tpu.memory_space<vmem>> -> memref<2x6x66x3xbf16, #tpu.memory_space<vmem>>
      %116 = tpu.memref_slice %arg7[%111] : memref<2x!tpu.dma_semaphore, #tpu.memory_space<semaphore_mem>> -> memref<1x!tpu.dma_semaphore, #tpu.memory_space<semaphore_mem>>
      %117 = tpu.memref_squeeze %116 : memref<1x!tpu.dma_semaphore, #tpu.memory_space<semaphore_mem>> -> memref<!tpu.dma_semaphore, #tpu.memory_space<semaphore_mem>>
      tpu.enqueue_dma source(%113 : memref<2x6x66x3xbf16, #tpu.memory_space<any>>) target(%115 : memref<2x6x66x3xbf16, #tpu.memory_space<vmem>>) target_semaphore(%117 : memref<!tpu.dma_semaphore, #tpu.memory_space<semaphore_mem>>)
    } else {
    }
    %c2_i32 = arith.constant 2 : i32
    %c0_i32_2 = arith.constant 0 : i32
    %7 = arith.cmpi eq, %c2_i32, %c0_i32_2 : i32
    %c1_i32_3 = arith.constant 1 : i32
    %8 = arith.select %7, %c1_i32_3, %c2_i32 : i32
    %9 = arith.remsi %arg0, %8 : i32
    %c0_i32_4 = arith.constant 0 : i32
    %10 = arith.cmpi ne, %9, %c0_i32_4 : i32
    %c0_i32_5 = arith.constant 0 : i32
    %11 = arith.cmpi slt, %9, %c0_i32_5 : i32
    %c0_i32_6 = arith.constant 0 : i32
    %12 = arith.cmpi slt, %8, %c0_i32_6 : i32
    %13 = arith.xori %11, %12 : i1
    %14 = arith.andi %13, %10 : i1
    %15 = arith.addi %9, %8 : i32
    %16 = arith.select %14, %15, %9 : i32
    %c4_i32 = arith.constant 4 : i32
    %17 = arith.muli %arg0, %c4_i32 : i32
    %c0_i32_7 = arith.constant 0 : i32
    %c0_i32_8 = arith.constant 0 : i32
    %c0_i32_9 = arith.constant 0 : i32
    %18 = tpu.memref_slice %arg1[%c0_i32_7, %17, %c0_i32_8, %c0_i32_9] : memref<2x66x66x3xbf16, #tpu.memory_space<any>> -> memref<2x6x66x3xbf16, #tpu.memory_space<any>>
    %c0_i32_10 = arith.constant 0 : i32
    %c0_i32_11 = arith.constant 0 : i32
    %c0_i32_12 = arith.constant 0 : i32
    %c0_i32_13 = arith.constant 0 : i32
    %19 = tpu.memref_slice %arg6[%16, %c0_i32_10, %c0_i32_11, %c0_i32_12, %c0_i32_13] : memref<2x2x6x66x3xbf16, #tpu.memory_space<vmem>> -> memref<1x2x6x66x3xbf16, #tpu.memory_space<vmem>>
    %20 = tpu.memref_squeeze %19 : memref<1x2x6x66x3xbf16, #tpu.memory_space<vmem>> -> memref<2x6x66x3xbf16, #tpu.memory_space<vmem>>
    %21 = tpu.memref_slice %arg7[%16] : memref<2x!tpu.dma_semaphore, #tpu.memory_space<semaphore_mem>> -> memref<1x!tpu.dma_semaphore, #tpu.memory_space<semaphore_mem>>
    %22 = tpu.memref_squeeze %21 : memref<1x!tpu.dma_semaphore, #tpu.memory_space<semaphore_mem>> -> memref<!tpu.dma_semaphore, #tpu.memory_space<semaphore_mem>>
    tpu.wait_dma2 semaphore(%22 : memref<!tpu.dma_semaphore, #tpu.memory_space<semaphore_mem>>) src(%18 : memref<2x6x66x3xbf16, #tpu.memory_space<any>>) dst(%20 : memref<2x6x66x3xbf16, #tpu.memory_space<vmem>>)
    %c2_i32_14 = arith.constant 2 : i32
    %c0_i32_15 = arith.constant 0 : i32
    %23 = arith.cmpi eq, %c2_i32_14, %c0_i32_15 : i32
    %c1_i32_16 = arith.constant 1 : i32
    %24 = arith.select %23, %c1_i32_16, %c2_i32_14 : i32
    %25 = arith.remsi %arg0, %24 : i32
    %c0_i32_17 = arith.constant 0 : i32
    %26 = arith.cmpi ne, %25, %c0_i32_17 : i32
    %c0_i32_18 = arith.constant 0 : i32
    %27 = arith.cmpi slt, %25, %c0_i32_18 : i32
    %c0_i32_19 = arith.constant 0 : i32
    %28 = arith.cmpi slt, %24, %c0_i32_19 : i32
    %29 = arith.xori %27, %28 : i1
    %30 = arith.andi %29, %26 : i1
    %31 = arith.addi %25, %24 : i32
    %32 = arith.select %30, %31, %25 : i32
    %33 = arith.index_cast %32 : i32 to index
    %c0 = arith.constant 0 : index
    %c0_20 = arith.constant 0 : index
    %c0_21 = arith.constant 0 : index
    %c0_22 = arith.constant 0 : index
    %34 = vector.load %arg6[%33, %c0, %c0_20, %c0_21, %c0_22] : memref<2x2x6x66x3xbf16, #tpu.memory_space<vmem>>, vector<1x2x6x66x3xbf16>
    %35 = vector.shape_cast %34 : vector<1x2x6x66x3xbf16> to vector<2x6x66x3xbf16>
    %36 = vector.extract_strided_slice %35 {offsets = [0, 0, 0, 0], sizes = [2, 4, 64, 3], strides = [1, 1, 1, 1]} : vector<2x6x66x3xbf16> to vector<2x4x64x3xbf16>
    %37 = vector.shape_cast %36 : vector<2x4x64x3xbf16> to vector<512x3xbf16>
    %c0_23 = arith.constant 0 : index
    %c0_24 = arith.constant 0 : index
    %c0_25 = arith.constant 0 : index
    %38 = vector.load %arg2[%c0_23, %c0_24, %c0_25] : memref<9x3x4xbf16, #tpu.memory_space<vmem>>, vector<1x3x4xbf16>
    %39 = vector.shape_cast %38 : vector<1x3x4xbf16> to vector<3x4xbf16>
    %cst = arith.constant dense<0.000000e+00> : vector<512x4xf32>
    %40 = tpu.matmul %37, %39, %cst {dimension_numbers = #tpu.dot_dimension_numbers<[1], [0], [0], [1], [0, 0, 1, 1], [], []>} : vector<512x3xbf16>, vector<3x4xbf16>, vector<512x4xf32> -> vector<512x4xf32>
    %41 = vector.extract_strided_slice %35 {offsets = [0, 0, 1, 0], sizes = [2, 4, 64, 3], strides = [1, 1, 1, 1]} : vector<2x6x66x3xbf16> to vector<2x4x64x3xbf16>
    %42 = vector.shape_cast %41 : vector<2x4x64x3xbf16> to vector<512x3xbf16>
    %c1 = arith.constant 1 : index
    %c0_26 = arith.constant 0 : index
    %c0_27 = arith.constant 0 : index
    %43 = vector.load %arg2[%c1, %c0_26, %c0_27] : memref<9x3x4xbf16, #tpu.memory_space<vmem>>, vector<1x3x4xbf16>
    %44 = vector.shape_cast %43 : vector<1x3x4xbf16> to vector<3x4xbf16>
    %cst_28 = arith.constant dense<0.000000e+00> : vector<512x4xf32>
    %45 = tpu.matmul %42, %44, %cst_28 {dimension_numbers = #tpu.dot_dimension_numbers<[1], [0], [0], [1], [0, 0, 1, 1], [], []>} : vector<512x3xbf16>, vector<3x4xbf16>, vector<512x4xf32> -> vector<512x4xf32>
    %46 = arith.addf %40, %45 : vector<512x4xf32>
    %47 = vector.extract_strided_slice %35 {offsets = [0, 0, 2, 0], sizes = [2, 4, 64, 3], strides = [1, 1, 1, 1]} : vector<2x6x66x3xbf16> to vector<2x4x64x3xbf16>
    %48 = vector.shape_cast %47 : vector<2x4x64x3xbf16> to vector<512x3xbf16>
    %c2 = arith.constant 2 : index
    %c0_29 = arith.constant 0 : index
    %c0_30 = arith.constant 0 : index
    %49 = vector.load %arg2[%c2, %c0_29, %c0_30] : memref<9x3x4xbf16, #tpu.memory_space<vmem>>, vector<1x3x4xbf16>
    %50 = vector.shape_cast %49 : vector<1x3x4xbf16> to vector<3x4xbf16>
    %cst_31 = arith.constant dense<0.000000e+00> : vector<512x4xf32>
    %51 = tpu.matmul %48, %50, %cst_31 {dimension_numbers = #tpu.dot_dimension_numbers<[1], [0], [0], [1], [0, 0, 1, 1], [], []>} : vector<512x3xbf16>, vector<3x4xbf16>, vector<512x4xf32> -> vector<512x4xf32>
    %52 = arith.addf %46, %51 : vector<512x4xf32>
    %53 = vector.extract_strided_slice %35 {offsets = [0, 1, 0, 0], sizes = [2, 4, 64, 3], strides = [1, 1, 1, 1]} : vector<2x6x66x3xbf16> to vector<2x4x64x3xbf16>
    %54 = vector.shape_cast %53 : vector<2x4x64x3xbf16> to vector<512x3xbf16>
    %c3 = arith.constant 3 : index
    %c0_32 = arith.constant 0 : index
    %c0_33 = arith.constant 0 : index
    %55 = vector.load %arg2[%c3, %c0_32, %c0_33] : memref<9x3x4xbf16, #tpu.memory_space<vmem>>, vector<1x3x4xbf16>
    %56 = vector.shape_cast %55 : vector<1x3x4xbf16> to vector<3x4xbf16>
    %cst_34 = arith.constant dense<0.000000e+00> : vector<512x4xf32>
    %57 = tpu.matmul %54, %56, %cst_34 {dimension_numbers = #tpu.dot_dimension_numbers<[1], [0], [0], [1], [0, 0, 1, 1], [], []>} : vector<512x3xbf16>, vector<3x4xbf16>, vector<512x4xf32> -> vector<512x4xf32>
    %58 = arith.addf %52, %57 : vector<512x4xf32>
    %59 = vector.extract_strided_slice %35 {offsets = [0, 1, 1, 0], sizes = [2, 4, 64, 3], strides = [1, 1, 1, 1]} : vector<2x6x66x3xbf16> to vector<2x4x64x3xbf16>
    %60 = vector.shape_cast %59 : vector<2x4x64x3xbf16> to vector<512x3xbf16>
    %c4 = arith.constant 4 : index
    %c0_35 = arith.constant 0 : index
    %c0_36 = arith.constant 0 : index
    %61 = vector.load %arg2[%c4, %c0_35, %c0_36] : memref<9x3x4xbf16, #tpu.memory_space<vmem>>, vector<1x3x4xbf16>
    %62 = vector.shape_cast %61 : vector<1x3x4xbf16> to vector<3x4xbf16>
    %cst_37 = arith.constant dense<0.000000e+00> : vector<512x4xf32>
    %63 = tpu.matmul %60, %62, %cst_37 {dimension_numbers = #tpu.dot_dimension_numbers<[1], [0], [0], [1], [0, 0, 1, 1], [], []>} : vector<512x3xbf16>, vector<3x4xbf16>, vector<512x4xf32> -> vector<512x4xf32>
    %64 = arith.addf %58, %63 : vector<512x4xf32>
    %65 = vector.extract_strided_slice %35 {offsets = [0, 1, 2, 0], sizes = [2, 4, 64, 3], strides = [1, 1, 1, 1]} : vector<2x6x66x3xbf16> to vector<2x4x64x3xbf16>
    %66 = vector.shape_cast %65 : vector<2x4x64x3xbf16> to vector<512x3xbf16>
    %c5 = arith.constant 5 : index
    %c0_38 = arith.constant 0 : index
    %c0_39 = arith.constant 0 : index
    %67 = vector.load %arg2[%c5, %c0_38, %c0_39] : memref<9x3x4xbf16, #tpu.memory_space<vmem>>, vector<1x3x4xbf16>
    %68 = vector.shape_cast %67 : vector<1x3x4xbf16> to vector<3x4xbf16>
    %cst_40 = arith.constant dense<0.000000e+00> : vector<512x4xf32>
    %69 = tpu.matmul %66, %68, %cst_40 {dimension_numbers = #tpu.dot_dimension_numbers<[1], [0], [0], [1], [0, 0, 1, 1], [], []>} : vector<512x3xbf16>, vector<3x4xbf16>, vector<512x4xf32> -> vector<512x4xf32>
    %70 = arith.addf %64, %69 : vector<512x4xf32>
    %71 = vector.extract_strided_slice %35 {offsets = [0, 2, 0, 0], sizes = [2, 4, 64, 3], strides = [1, 1, 1, 1]} : vector<2x6x66x3xbf16> to vector<2x4x64x3xbf16>
    %72 = vector.shape_cast %71 : vector<2x4x64x3xbf16> to vector<512x3xbf16>
    %c6 = arith.constant 6 : index
    %c0_41 = arith.constant 0 : index
    %c0_42 = arith.constant 0 : index
    %73 = vector.load %arg2[%c6, %c0_41, %c0_42] : memref<9x3x4xbf16, #tpu.memory_space<vmem>>, vector<1x3x4xbf16>
    %74 = vector.shape_cast %73 : vector<1x3x4xbf16> to vector<3x4xbf16>
    %cst_43 = arith.constant dense<0.000000e+00> : vector<512x4xf32>
    %75 = tpu.matmul %72, %74, %cst_43 {dimension_numbers = #tpu.dot_dimension_numbers<[1], [0], [0], [1], [0, 0, 1, 1], [], []>} : vector<512x3xbf16>, vector<3x4xbf16>, vector<512x4xf32> -> vector<512x4xf32>
    %76 = arith.addf %70, %75 : vector<512x4xf32>
    %77 = vector.extract_strided_slice %35 {offsets = [0, 2, 1, 0], sizes = [2, 4, 64, 3], strides = [1, 1, 1, 1]} : vector<2x6x66x3xbf16> to vector<2x4x64x3xbf16>
    %78 = vector.shape_cast %77 : vector<2x4x64x3xbf16> to vector<512x3xbf16>
    %c7 = arith.constant 7 : index
    %c0_44 = arith.constant 0 : index
    %c0_45 = arith.constant 0 : index
    %79 = vector.load %arg2[%c7, %c0_44, %c0_45] : memref<9x3x4xbf16, #tpu.memory_space<vmem>>, vector<1x3x4xbf16>
    %80 = vector.shape_cast %79 : vector<1x3x4xbf16> to vector<3x4xbf16>
    %cst_46 = arith.constant dense<0.000000e+00> : vector<512x4xf32>
    %81 = tpu.matmul %78, %80, %cst_46 {dimension_numbers = #tpu.dot_dimension_numbers<[1], [0], [0], [1], [0, 0, 1, 1], [], []>} : vector<512x3xbf16>, vector<3x4xbf16>, vector<512x4xf32> -> vector<512x4xf32>
    %82 = arith.addf %76, %81 : vector<512x4xf32>
    %83 = vector.extract_strided_slice %35 {offsets = [0, 2, 2, 0], sizes = [2, 4, 64, 3], strides = [1, 1, 1, 1]} : vector<2x6x66x3xbf16> to vector<2x4x64x3xbf16>
    %84 = vector.shape_cast %83 : vector<2x4x64x3xbf16> to vector<512x3xbf16>
    %c8 = arith.constant 8 : index
    %c0_47 = arith.constant 0 : index
    %c0_48 = arith.constant 0 : index
    %85 = vector.load %arg2[%c8, %c0_47, %c0_48] : memref<9x3x4xbf16, #tpu.memory_space<vmem>>, vector<1x3x4xbf16>
    %86 = vector.shape_cast %85 : vector<1x3x4xbf16> to vector<3x4xbf16>
    %cst_49 = arith.constant dense<0.000000e+00> : vector<512x4xf32>
    %87 = tpu.matmul %84, %86, %cst_49 {dimension_numbers = #tpu.dot_dimension_numbers<[1], [0], [0], [1], [0, 0, 1, 1], [], []>} : vector<512x3xbf16>, vector<3x4xbf16>, vector<512x4xf32> -> vector<512x4xf32>
    %88 = arith.addf %82, %87 : vector<512x4xf32>
    %c0_50 = arith.constant 0 : index
    %c0_51 = arith.constant 0 : index
    %89 = vector.load %arg3[%c0_50, %c0_51] : memref<1x4xf32, #tpu.memory_space<vmem>>, vector<1x4xf32>
    %90 = vector.broadcast %89 : vector<1x4xf32> to vector<512x4xf32>
    %91 = arith.mulf %88, %90 : vector<512x4xf32>
    %c0_52 = arith.constant 0 : index
    %c0_53 = arith.constant 0 : index
    %92 = vector.load %arg4[%c0_52, %c0_53] : memref<1x4xf32, #tpu.memory_space<vmem>>, vector<1x4xf32>
    %93 = vector.broadcast %92 : vector<1x4xf32> to vector<512x4xf32>
    %94 = arith.addf %91, %93 : vector<512x4xf32>
    %cst_54 = arith.constant 0.000000e+00 : f32
    %95 = vector.broadcast %cst_54 : f32 to vector<512x4xf32>
    %96 = arith.maximumf %94, %95 : vector<512x4xf32>
    %97 = vector.shape_cast %96 : vector<512x4xf32> to vector<2x4x64x4xf32>
    %98 = arith.truncf %97 : vector<2x4x64x4xf32> to vector<2x4x64x4xbf16>
    %c0_55 = arith.constant 0 : index
    %c0_56 = arith.constant 0 : index
    %c0_57 = arith.constant 0 : index
    %c0_58 = arith.constant 0 : index
    %99 = vector.load %arg5[%c0_55, %c0_56, %c0_57, %c0_58] : memref<2x4x64x4xbf16, #tpu.memory_space<vmem>>, vector<2x4x64x4xbf16>
    tpu.vector_store %arg5[%c0_55, %c0_56, %c0_57, %c0_58], %98 {strides = array<i32>} : memref<2x4x64x4xbf16, #tpu.memory_space<vmem>>, vector<2x4x64x4xbf16>,
    return
  }
  func.func @transform_1(%arg0: i32) -> (i32, i32, i32) {
    %c0_i32 = arith.constant 0 : i32
    %c0_i32_0 = arith.constant 0 : i32
    %c0_i32_1 = arith.constant 0 : i32
    %c0_i32_2 = arith.constant 0 : i32
    return %c0_i32, %c0_i32_0, %c0_i32_1 : i32, i32, i32
  }
  func.func @transform_2(%arg0: i32) -> (i32, i32) {
    %c0_i32 = arith.constant 0 : i32
    %c0_i32_0 = arith.constant 0 : i32
    %c0_i32_1 = arith.constant 0 : i32
    return %c0_i32, %c0_i32_0 : i32, i32
  }
  func.func @transform_3(%arg0: i32) -> (i32, i32) {
    %c0_i32 = arith.constant 0 : i32
    %c0_i32_0 = arith.constant 0 : i32
    %c0_i32_1 = arith.constant 0 : i32
    return %c0_i32, %c0_i32_0 : i32, i32
  }
  func.func @transform_4(%arg0: i32) -> (i32, i32, i32, i32) {
    %c0_i32 = arith.constant 0 : i32
    %c0_i32_0 = arith.constant 0 : i32
    %c0_i32_1 = arith.constant 0 : i32
    %c0_i32_2 = arith.constant 0 : i32
    return %c0_i32, %arg0, %c0_i32_0, %c0_i32_1 : i32, i32, i32, i32
  }
}

module attributes {stable_mosaic.version = 11 : i64} {
  func.func @_matmul_bn_act_kernel(%arg0: i32, %arg1: memref<512x27xbf16, #tpu.memory_space<vmem>>, %arg2: memref<27x4xbf16, #tpu.memory_space<vmem>>, %arg3: memref<1x4xf32, #tpu.memory_space<vmem>>, %arg4: memref<1x4xf32, #tpu.memory_space<vmem>>, %arg5: memref<512x4xbf16, #tpu.memory_space<vmem>>) attributes {dimension_semantics = [#tpu.dimension_semantics<parallel>], iteration_bounds = array<i64: 16>, scalar_prefetch = 0 : i64, scratch_operands = 0 : i64, tpu.core_type = #tpu.core_type<tc>, window_params = [{transform_indices = @transform_0, window_bounds = array<i64: 512, 27>}, {pipeline_mode = #tpu.pipeline_mode<synchronous>, transform_indices = @transform_1, window_bounds = array<i64: 27, 4>}, {pipeline_mode = #tpu.pipeline_mode<synchronous>, transform_indices = @transform_2, window_bounds = array<i64: 1, 4>}, {pipeline_mode = #tpu.pipeline_mode<synchronous>, transform_indices = @transform_3, window_bounds = array<i64: 1, 4>}, {transform_indices = @transform_4, window_bounds = array<i64: 512, 4>}]} {
    %c0 = arith.constant 0 : index
    %c0_0 = arith.constant 0 : index
    %0 = vector.load %arg1[%c0, %c0_0] : memref<512x27xbf16, #tpu.memory_space<vmem>>, vector<512x27xbf16>
    %c0_1 = arith.constant 0 : index
    %c0_2 = arith.constant 0 : index
    %1 = vector.load %arg2[%c0_1, %c0_2] : memref<27x4xbf16, #tpu.memory_space<vmem>>, vector<27x4xbf16>
    %cst = arith.constant dense<0.000000e+00> : vector<512x4xf32>
    %2 = tpu.matmul %0, %1, %cst {dimension_numbers = #tpu.dot_dimension_numbers<[1], [0], [0], [1], [0, 0, 1, 1], [], []>} : vector<512x27xbf16>, vector<27x4xbf16>, vector<512x4xf32> -> vector<512x4xf32>
    %c0_3 = arith.constant 0 : index
    %c0_4 = arith.constant 0 : index
    %3 = vector.load %arg3[%c0_3, %c0_4] : memref<1x4xf32, #tpu.memory_space<vmem>>, vector<1x4xf32>
    %4 = vector.broadcast %3 : vector<1x4xf32> to vector<512x4xf32>
    %5 = arith.mulf %2, %4 : vector<512x4xf32>
    %c0_5 = arith.constant 0 : index
    %c0_6 = arith.constant 0 : index
    %6 = vector.load %arg4[%c0_5, %c0_6] : memref<1x4xf32, #tpu.memory_space<vmem>>, vector<1x4xf32>
    %7 = vector.broadcast %6 : vector<1x4xf32> to vector<512x4xf32>
    %8 = arith.addf %5, %7 : vector<512x4xf32>
    %cst_7 = arith.constant 0.000000e+00 : f32
    %9 = vector.broadcast %cst_7 : f32 to vector<512x4xf32>
    %10 = arith.maximumf %8, %9 : vector<512x4xf32>
    %11 = arith.truncf %10 : vector<512x4xf32> to vector<512x4xbf16>
    %c0_8 = arith.constant 0 : index
    %c0_9 = arith.constant 0 : index
    %12 = vector.load %arg5[%c0_8, %c0_9] : memref<512x4xbf16, #tpu.memory_space<vmem>>, vector<512x4xbf16>
    tpu.vector_store %arg5[%c0_8, %c0_9], %11 {strides = array<i32>} : memref<512x4xbf16, #tpu.memory_space<vmem>>, vector<512x4xbf16>,
    return
  }
  func.func @transform_0(%arg0: i32) -> (i32, i32) {
    %c0_i32 = arith.constant 0 : i32
    %c0_i32_0 = arith.constant 0 : i32
    return %arg0, %c0_i32 : i32, i32
  }
  func.func @transform_1(%arg0: i32) -> (i32, i32) {
    %c0_i32 = arith.constant 0 : i32
    %c0_i32_0 = arith.constant 0 : i32
    %c0_i32_1 = arith.constant 0 : i32
    return %c0_i32, %c0_i32_0 : i32, i32
  }
  func.func @transform_2(%arg0: i32) -> (i32, i32) {
    %c0_i32 = arith.constant 0 : i32
    %c0_i32_0 = arith.constant 0 : i32
    %c0_i32_1 = arith.constant 0 : i32
    return %c0_i32, %c0_i32_0 : i32, i32
  }
  func.func @transform_3(%arg0: i32) -> (i32, i32) {
    %c0_i32 = arith.constant 0 : i32
    %c0_i32_0 = arith.constant 0 : i32
    %c0_i32_1 = arith.constant 0 : i32
    return %c0_i32, %c0_i32_0 : i32, i32
  }
  func.func @transform_4(%arg0: i32) -> (i32, i32) {
    %c0_i32 = arith.constant 0 : i32
    %c0_i32_0 = arith.constant 0 : i32
    return %arg0, %c0_i32 : i32, i32
  }
}

</mosaic_0001>

<bundles_post_ra>
// kernel: tpu_custom_call.1
= control target key start
LH: loop header
LB: loop body
LE: loop exit
PB: predicated region body
PF: predicated region fallthrough
CT: control target
= control target key end

     0   :  { %6 = vsyncpa [#allocation3], 0  ;;  %s115_s0 = inlined_call_operand.hbm [shape: f32[8,128], index: 0, kind: input, shape index: {}]   ;;  %s116_s1 = inlined_call_operand.hbm [shape: f32[8,128], index: 1, kind: output, shape index: {}]  }
   0x1   :  { %7 = vsyncpa [#allocation4], 0  ;;  %s13_s8 = sshll.u32 %s115_s0, 4  ;;  %s97_s9 = smov [#allocation2]   ;;  %s14_s8 = int_to_ptr.hbm [resolvable:$true] %s13_s8 }
   0x2   :  { %s15_s10 = sshll.u32 %s97_s9, 4  ;;  %s16_s10 = int_to_ptr.vmem [resolvable:$true] %s15_s10 }
   0x3   :  { %18 = dma.hbm_to_vmem [thread:$0]  %s14_s8, 128, %s16_s10, [#allocation3]  }
   0x4   :  { %93 = dma.done.wait [#allocation3], 128  }
   0x5   :  { %94 = vsyncadd [#allocation3], 4294967168  ;;  %s98_s11 = smov [#allocation5]   ;;  %s33_s15 = sshll.u32 %s116_s1, 4  ;;  %v23_v0 = vld [vmem:[#allocation2] sm:$0xff]  ;;  %s34_s15 = int_to_ptr.hbm [resolvable:$true] %s33_s15 }
   0x6   :  { %s31_s12 = sshll.u32 %s98_s11, 4  ;;  %v24_v1 = vadd.f32 1.0, %v23_v0  ;;  %s32_s12 = int_to_ptr.vmem [resolvable:$true] %s31_s12 }
   0x8   :  { %25 = vst [vmem:[#allocation5] sm:$0xff] %v24_v1 }
   0x9   :  { %36 = dma.vmem_to_hbm [thread:$0]  %s32_s12, 128, %s34_s15, [#allocation4]  }
   0xa   :  { %95 = dma.done.wait [#allocation4], 128  }
   0xb   :  { %96 = vsyncadd [#allocation4], 4294967168 }
   0xc   :  { %41 = vsyncpa [#allocation3], 1 }
   0xd   :  { %42 = vsyncpa [#allocation4], 1 }

// kernel: tpu_custom_call.1
= control target key start
LH: loop header
LB: loop body
LE: loop exit
PB: predicated region body
PF: predicated region fallthrough
CT: control target
= control target key end

     0   :  { %s1363_s15 = smov 0   ;;  %s1730_s0 = inlined_call_operand.vmem [shape: bf16[8192,27], index: 0, kind: input, shape index: {}]   ;;  %s1731_s1 = inlined_call_operand.vmem [shape: bf16[27,4], index: 1, kind: input, shape index: {}]   ;;  %s1732_s2 = inlined_call_operand.vmem [shape: f32[1,4], index: 2, kind: input, shape index: {}]   ;;  %s1733_s3 = inlined_call_operand.vmem [shape: f32[1,4], index: 3, kind: input, shape index: {}]   ;;  %s1734_s4 = inlined_call_operand.vmem [shape: bf16[8192,4], index: 4, kind: output, shape index: {}]  }
   0x1 LB: > { %s1099_s16 = sadd.s32 4294967295, %s1335_s15   ;;  %p1103_p0 = scmp.ge.s32.totalorder %s1335_s15, 1  ;;  %s1335_s15 = sphi %s1363_s15, %s14_s15  }
   0x2   : > { %p163_p1 = scmp.lt.s32.totalorder %s1335_s15, 17 }
   0x4   : > { %p164_p2 = pnand %p1103_p0, %p163_p1 }
   0x5   : > { %s1104_s21 = sshll.u32 (!%p164_p2), %s1099_s16, 6 }
   0x6   : > { %167 = sbr.rel (%p164_p2) target bundleno = 287 (0x11f), region = 36  ;;  %p190_p3 = scmp.lt.s32.totalorder (!%p164_p2), %s1104_s21, 1023 }
   0xb   : > { %v1242_v0 = vld [vmem:[%s1731_s1 + $0x8] sm:$0xf]  ;;  %v1311_v1 = vld [vmem:[%s1731_s1 + $0x8] sm:$0x30]  ;;  %vm538_vm0 = vcmask 1044480   ;;  %vm539_vm1 = vcmask 1045504  }
   0xc   : > { %v1243_v2 = vor.u32 %v1311_v1, %v1242_v0  ;;  %v1337_v3 = vmov 65535   ;;  %s1736_s21 = smov (!%p190_p3, %s1104_s21), 1023  ;;  %v1310_v7 = vld [vmem:[%s1731_s1] sm:$0xff]  ;;  %vm441_vm2 = vcmask 220160   ;;  %vm978_vm3 = vcmask 27648  }
   0xd   : > { %v540_v4 = vsel %vm538_vm0, 4294967295, %v1337_v3  ;;  %s1105_s24 = sshll.u32 %s1736_s21, 2  ;;  %v1457_v40 = vld [vmem:[%s1732_s2] ss:$0 sm:$0xff] }
   0xe   : > { %v541_v5 = vsel %vm539_vm1, %v540_v4, 0  ;;  %s1388_s27 = scalar_lea.vmem %s1730_s0, %s1105_s24  ;;  %v1462_v41 = vld [vmem:[%s1733_s3] ss:$0 sm:$0xff]  ;;  %s1473_s8 = scalar_lea.vmem %s1734_s4, %s1105_s24 }
   0xf   : > { %v543_v6 = vand.u32 %v1243_v2, %v541_v5  ;;  %v1278_v8 = vld [vmem:[%s1388_s27] sm:$0xff]  ;;  %v1279_v12 = vld [vmem:[%s1388_s27 + $0x8] sm:$0xff]  ;;  %v1280_v16 = vld [vmem:[%s1388_s27 + $0x10] sm:$0xff] }
  0x10   : > { %v1286_v9 = vld [vmem:[%s1388_s27 + $0x40] sm:$0xff]  ;;  %v1287_v13 = vld [vmem:[%s1388_s27 + $0x48] sm:$0xff]  ;;  %v1288_v17 = vld [vmem:[%s1388_s27 + $0x50] sm:$0xff] }
  0x11   : > { %551 = vmatpush.bf16.msra.mxu0 %v543_v6  ;;  %1312 = vmatpush.bf16.msra.mxu1 %v543_v6  ;;  %v1294_v10 = vld [vmem:[%s1388_s27 + $0x80] sm:$0xff]  ;;  %v1295_v14 = vld [vmem:[%s1388_s27 + $0x88] sm:$0xff]  ;;  %v1296_v18 = vld [vmem:[%s1388_s27 + $0x90] sm:$0xff] }
  0x12   : > { %1313 = vmatpush.bf16.msra.mxu2 %v543_v6  ;;  %1314 = vmatpush.bf16.msra.mxu3 %v543_v6  ;;  %v1302_v11 = vld [vmem:[%s1388_s27 + $0xc0] sm:$0xff]  ;;  %v1303_v15 = vld [vmem:[%s1388_s27 + $0xc8] sm:$0xff]  ;;  %v1304_v19 = vld [vmem:[%s1388_s27 + $0xd0] sm:$0xff] }
  0x13   : > { %v1281_v20 = vld [vmem:[%s1388_s27 + $0x18] sm:$0xff]  ;;  %v1282_v24 = vld [vmem:[%s1388_s27 + $0x20] sm:$0xff]  ;;  %v1283_v28 = vld [vmem:[%s1388_s27 + $0x28] sm:$0xff] }
  0x14   : > { %v1289_v21 = vld [vmem:[%s1388_s27 + $0x58] sm:$0xff]  ;;  %v1290_v25 = vld [vmem:[%s1388_s27 + $0x60] sm:$0xff]  ;;  %v1291_v29 = vld [vmem:[%s1388_s27 + $0x68] sm:$0xff] }
  0x15   : > { %552 = vmatpush.bf16.msra.mxu0 %v1310_v7  ;;  %1315 = vmatpush.bf16.msra.mxu1 %v1310_v7  ;;  %v1297_v22 = vld [vmem:[%s1388_s27 + $0x98] sm:$0xff]  ;;  %v1298_v26 = vld [vmem:[%s1388_s27 + $0xa0] sm:$0xff]  ;;  %v1299_v30 = vld [vmem:[%s1388_s27 + $0xa8] sm:$0xff] }
  0x16   : > { %1316 = vmatpush.bf16.msra.mxu2 %v1310_v7  ;;  %1317 = vmatpush.bf16.msra.mxu3 %v1310_v7  ;;  %v1305_v23 = vld [vmem:[%s1388_s27 + $0xd8] sm:$0xff]  ;;  %v1306_v27 = vld [vmem:[%s1388_s27 + $0xe0] sm:$0xff]  ;;  %v1307_v31 = vld [vmem:[%s1388_s27 + $0xe8] sm:$0xff] }
  0x17   : > { %v1284_v32 = vld [vmem:[%s1388_s27 + $0x30] sm:$0xff]  ;;  %v1285_v36 = vld [vmem:[%s1388_s27 + $0x38] sm:$0xff] }
  0x18   : > { %1244 = vmatmul.msk.bf16.vlgmr.msra.gmra.mxu0 %vm441_vm2, %v1278_v8  ;;  %1252 = vmatmul.msk.bf16.vlgmr.msra.gmra.mxu1 %vm441_vm2, %v1286_v9  ;;  %v1292_v33 = vld [vmem:[%s1388_s27 + $0x70] sm:$0xff]  ;;  %v1293_v37 = vld [vmem:[%s1388_s27 + $0x78] sm:$0xff] }
  0x19   : > { %1260 = vmatmul.msk.bf16.vlgmr.msra.gmra.mxu2 %vm441_vm2, %v1294_v10  ;;  %1268 = vmatmul.msk.bf16.vlgmr.msra.gmra.mxu3 %vm441_vm2, %v1302_v11  ;;  %v1300_v34 = vld [vmem:[%s1388_s27 + $0xb0] sm:$0xff]  ;;  %v1301_v38 = vld [vmem:[%s1388_s27 + $0xb8] sm:$0xff] }
  0x1a   : > { %v1308_v35 = vld [vmem:[%s1388_s27 + $0xf0] sm:$0xff]  ;;  %v1309_v39 = vld [vmem:[%s1388_s27 + $0xf8] sm:$0xff] }
  0x28   : > { %1245 = vmatmul.msk.bf16.gmra.mxu0 %vm441_vm2, %v1279_v12  ;;  %1253 = vmatmul.msk.bf16.gmra.mxu1 %vm441_vm2, %v1287_v13 }
  0x29   : > { %1261 = vmatmul.msk.bf16.gmra.mxu2 %vm441_vm2, %v1295_v14  ;;  %1269 = vmatmul.msk.bf16.gmra.mxu3 %vm441_vm2, %v1303_v15 }
  0x38   : > { %1246 = vmatmul.msk.bf16.gmra.mxu0 %vm441_vm2, %v1280_v16  ;;  %1254 = vmatmul.msk.bf16.gmra.mxu1 %vm441_vm2, %v1288_v17 }
  0x39   : > { %1262 = vmatmul.msk.bf16.gmra.mxu2 %vm441_vm2, %v1296_v18  ;;  %1270 = vmatmul.msk.bf16.gmra.mxu3 %vm441_vm2, %v1304_v19 }
  0x48   : > { %1247 = vmatmul.msk.bf16.gmra.mxu0 %vm441_vm2, %v1281_v20  ;;  %1255 = vmatmul.msk.bf16.gmra.mxu1 %vm441_vm2, %v1289_v21 }
  0x49   : > { %1263 = vmatmul.msk.bf16.gmra.mxu2 %vm441_vm2, %v1297_v22  ;;  %1271 = vmatmul.msk.bf16.gmra.mxu3 %vm441_vm2, %v1305_v23 }
  0x58   : > { %1248 = vmatmul.msk.bf16.gmra.mxu0 %vm441_vm2, %v1282_v24  ;;  %1256 = vmatmul.msk.bf16.gmra.mxu1 %vm441_vm2, %v1290_v25 }
  0x59   : > { %1264 = vmatmul.msk.bf16.gmra.mxu2 %vm441_vm2, %v1298_v26  ;;  %1272 = vmatmul.msk.bf16.gmra.mxu3 %vm441_vm2, %v1306_v27 }
  0x68   : > { %1249 = vmatmul.msk.bf16.gmra.mxu0 %vm441_vm2, %v1283_v28  ;;  %1257 = vmatmul.msk.bf16.gmra.mxu1 %vm441_vm2, %v1291_v29 }
  0x69   : > { %1265 = vmatmul.msk.bf16.gmra.mxu2 %vm441_vm2, %v1299_v30  ;;  %1273 = vmatmul.msk.bf16.gmra.mxu3 %vm441_vm2, %v1307_v31 }
  0x78   : > { %1250 = vmatmul.msk.bf16.gmra.mxu0 %vm441_vm2, %v1284_v32  ;;  %1258 = vmatmul.msk.bf16.gmra.mxu1 %vm441_vm2, %v1292_v33 }
  0x79   : > { %1266 = vmatmul.msk.bf16.gmra.mxu2 %vm441_vm2, %v1300_v34  ;;  %1274 = vmatmul.msk.bf16.gmra.mxu3 %vm441_vm2, %v1308_v35 }
  0x88   : > { %1251 = vmatmul.msk.bf16.gmra.mxu0 %vm441_vm2, %v1285_v36  ;;  %1259 = vmatmul.msk.bf16.gmra.mxu1 %vm441_vm2, %v1293_v37 }
  0x89   : > { %1267 = vmatmul.msk.bf16.gmra.mxu2 %vm441_vm2, %v1301_v38  ;;  %1275 = vmatmul.msk.bf16.gmra.mxu3 %vm441_vm2, %v1309_v39 }
  0x95   : > { %v554_v42 = vpop.f32.mrf.mxu0  ;;  %v594_v43 = vpop.f32.mrf.mxu1 }
  0x96   : > { %v718_v44 = vmul.f32 %v1457_v40, %v554_v42  ;;  %v734_v45 = vmul.f32 %v1457_v40, %v594_v43 }
  0x98   : > { %v786_v46 = vadd.f32 %v1462_v41, %v718_v44  ;;  %v802_v47 = vadd.f32 %v1462_v41, %v734_v45 }
  0x9a   : > { %v850_v48 = vmax.f32 %v786_v46, 0.0  ;;  %v866_v49 = vmax.f32 %v802_v47, 0.0 }
  0x9c   : > { %v914_v50 = vpack.c.bf16 %v850_v48, %v850_v48  ;;  %v930_v51 = vpack.c.bf16 %v866_v49, %v866_v49  ;;  %v634_v52 = vpop.f32.mrf.mxu2  ;;  %v674_v53 = vpop.f32.mrf.mxu3 }
  0x9d   : > { %v750_v54 = vmul.f32 %v1457_v40, %v634_v52  ;;  %v766_v55 = vmul.f32 %v1457_v40, %v674_v53  ;;  %v556_v56 = vpop.f32.mrf.mxu0  ;;  %v596_v57 = vpop.f32.mrf.mxu1 }
  0x9e   : > { %979 = vst.msk [vmem:[%s1473_s8] sm:$0xf] %vm978_vm3, %v914_v50  ;;  %v719_v58 = vmul.f32 %v1457_v40, %v556_v56  ;;  %v735_v59 = vmul.f32 %v1457_v40, %v596_v57 }
  0x9f   : > { %995 = vst.msk [vmem:[%s1473_s8 + $0x40] sm:$0xf] %vm978_vm3, %v930_v51  ;;  %v818_v60 = vadd.f32 %v1462_v41, %v750_v54  ;;  %v834_v61 = vadd.f32 %v1462_v41, %v766_v55 }
  0xa0   : > { %v787_v62 = vadd.f32 %v1462_v41, %v719_v58  ;;  %v803_v63 = vadd.f32 %v1462_v41, %v735_v59 }
  0xa1   : > { %v882_v0 = vmax.f32 %v818_v60, 0.0  ;;  %v898_v1 = vmax.f32 %v834_v61, 0.0 }
  0xa2   : > { %v851_v2 = vmax.f32 %v787_v62, 0.0  ;;  %v867_v3 = vmax.f32 %v803_v63, 0.0 }
  0xa3   : > { %v946_v4 = vpack.c.bf16 %v882_v0, %v882_v0  ;;  %v962_v5 = vpack.c.bf16 %v898_v1, %v898_v1 }
  0xa4   : > { %v915_v6 = vpack.c.bf16 %v851_v2, %v851_v2  ;;  %v931_v7 = vpack.c.bf16 %v867_v3, %v867_v3  ;;  %v636_v8 = vpop.f32.mrf.mxu2  ;;  %v676_v9 = vpop.f32.mrf.mxu3 }
  0xa5   : > { %1011 = vst.msk [vmem:[%s1473_s8 + $0x80] sm:$0xf] %vm978_vm3, %v946_v4  ;;  %v751_v10 = vmul.f32 %v1457_v40, %v636_v8  ;;  %v767_v11 = vmul.f32 %v1457_v40, %v676_v9  ;;  %v559_v12 = vpop.f32.mrf.mxu0  ;;  %v599_v13 = vpop.f32.mrf.mxu1 }
  0xa6   : > { %1027 = vst.msk [vmem:[%s1473_s8 + $0xc0] sm:$0xf] %vm978_vm3, %v962_v5  ;;  %v720_v14 = vmul.f32 %v1457_v40, %v559_v12  ;;  %v736_v15 = vmul.f32 %v1457_v40, %v599_v13 }
  0xa7   : > { %980 = vst.msk [vmem:[%s1473_s8 + $0x4] sm:$0xf] %vm978_vm3, %v915_v6  ;;  %v819_v16 = vadd.f32 %v1462_v41, %v751_v10  ;;  %v835_v17 = vadd.f32 %v1462_v41, %v767_v11 }
  0xa8   : > { %996 = vst.msk [vmem:[%s1473_s8 + $0x44] sm:$0xf] %vm978_vm3, %v931_v7  ;;  %v788_v18 = vadd.f32 %v1462_v41, %v720_v14  ;;  %v804_v19 = vadd.f32 %v1462_v41, %v736_v15 }
  0xa9   : > { %v883_v20 = vmax.f32 %v819_v16, 0.0  ;;  %v899_v21 = vmax.f32 %v835_v17, 0.0 }
  0xaa   : > { %v852_v22 = vmax.f32 %v788_v18, 0.0  ;;  %v868_v23 = vmax.f32 %v804_v19, 0.0 }
  0xab   : > { %v947_v24 = vpack.c.bf16 %v883_v20, %v883_v20  ;;  %v963_v25 = vpack.c.bf16 %v899_v21, %v899_v21 }
  0xac   : > { %v916_v26 = vpack.c.bf16 %v852_v22, %v852_v22  ;;  %v932_v27 = vpack.c.bf16 %v868_v23, %v868_v23  ;;  %v639_v28 = vpop.f32.mrf.mxu2  ;;  %v679_v29 = vpop.f32.mrf.mxu3 }
  0xad   : > { %1012 = vst.msk [vmem:[%s1473_s8 + $0x84] sm:$0xf] %vm978_vm3, %v947_v24  ;;  %v752_v30 = vmul.f32 %v1457_v40, %v639_v28  ;;  %v768_v31 = vmul.f32 %v1457_v40, %v679_v29  ;;  %v561_v32 = vpop.f32.mrf.mxu0  ;;  %v601_v33 = vpop.f32.mrf.mxu1 }
  0xae   : > { %1028 = vst.msk [vmem:[%s1473_s8 + $0xc4] sm:$0xf] %vm978_vm3, %v963_v25  ;;  %v721_v34 = vmul.f32 %v1457_v40, %v561_v32  ;;  %v737_v35 = vmul.f32 %v1457_v40, %v601_v33 }
  0xaf   : > { %981 = vst.msk [vmem:[%s1473_s8 + $0x8] sm:$0xf] %vm978_vm3, %v916_v26  ;;  %v820_v36 = vadd.f32 %v1462_v41, %v752_v30  ;;  %v836_v37 = vadd.f32 %v1462_v41, %v768_v31 }
  0xb0   : > { %997 = vst.msk [vmem:[%s1473_s8 + $0x48] sm:$0xf] %vm978_vm3, %v932_v27  ;;  %v789_v38 = vadd.f32 %v1462_v41, %v721_v34  ;;  %v805_v39 = vadd.f32 %v1462_v41, %v737_v35 }
  0xb1   : > { %v884_v42 = vmax.f32 %v820_v36, 0.0  ;;  %v900_v43 = vmax.f32 %v836_v37, 0.0 }
  0xb2   : > { %v853_v44 = vmax.f32 %v789_v38, 0.0  ;;  %v869_v45 = vmax.f32 %v805_v39, 0.0 }
  0xb3   : > { %v948_v46 = vpack.c.bf16 %v884_v42, %v884_v42  ;;  %v964_v47 = vpack.c.bf16 %v900_v43, %v900_v43 }
  0xb4   : > { %v917_v48 = vpack.c.bf16 %v853_v44, %v853_v44  ;;  %v933_v49 = vpack.c.bf16 %v869_v45, %v869_v45  ;;  %v641_v50 = vpop.f32.mrf.mxu2  ;;  %v681_v51 = vpop.f32.mrf.mxu3 }
  0xb5   : > { %1013 = vst.msk [vmem:[%s1473_s8 + $0x88] sm:$0xf] %vm978_vm3, %v948_v46  ;;  %v753_v52 = vmul.f32 %v1457_v40, %v641_v50  ;;  %v769_v53 = vmul.f32 %v1457_v40, %v681_v51  ;;  %v564_v54 = vpop.f32.mrf.mxu0  ;;  %v604_v55 = vpop.f32.mrf.mxu1 }
  0xb6   : > { %1029 = vst.msk [vmem:[%s1473_s8 + $0xc8] sm:$0xf] %vm978_vm3, %v964_v47  ;;  %v722_v56 = vmul.f32 %v1457_v40, %v564_v54  ;;  %v738_v57 = vmul.f32 %v1457_v40, %v604_v55 }
  0xb7   : > { %982 = vst.msk [vmem:[%s1473_s8 + $0xc] sm:$0xf] %vm978_vm3, %v917_v48  ;;  %v821_v58 = vadd.f32 %v1462_v41, %v753_v52  ;;  %v837_v59 = vadd.f32 %v1462_v41, %v769_v53 }
  0xb8   : > { %998 = vst.msk [vmem:[%s1473_s8 + $0x4c] sm:$0xf] %vm978_vm3, %v933_v49  ;;  %v790_v60 = vadd.f32 %v1462_v41, %v722_v56  ;;  %v806_v61 = vadd.f32 %v1462_v41, %v738_v57 }
  0xb9   : > { %v885_v62 = vmax.f32 %v821_v58, 0.0  ;;  %v901_v63 = vmax.f32 %v837_v59, 0.0 }
  0xba   : > { %v854_v0 = vmax.f32 %v790_v60, 0.0  ;;  %v870_v1 = vmax.f32 %v806_v61, 0.0 }
  0xbb   : > { %v949_v2 = vpack.c.bf16 %v885_v62, %v885_v62  ;;  %v965_v3 = vpack.c.bf16 %v901_v63, %v901_v63 }
  0xbc   : > { %v918_v4 = vpack.c.bf16 %v854_v0, %v854_v0  ;;  %v934_v5 = vpack.c.bf16 %v870_v1, %v870_v1  ;;  %v644_v6 = vpop.f32.mrf.mxu2  ;;  %v684_v7 = vpop.f32.mrf.mxu3 }
  0xbd   : > { %1014 = vst.msk [vmem:[%s1473_s8 + $0x8c] sm:$0xf] %vm978_vm3, %v949_v2  ;;  %v754_v8 = vmul.f32 %v1457_v40, %v644_v6  ;;  %v770_v9 = vmul.f32 %v1457_v40, %v684_v7  ;;  %v566_v10 = vpop.f32.mrf.mxu0  ;;  %v606_v11 = vpop.f32.mrf.mxu1 }
  0xbe   : > { %1030 = vst.msk [vmem:[%s1473_s8 + $0xcc] sm:$0xf] %vm978_vm3, %v965_v3  ;;  %v723_v12 = vmul.f32 %v1457_v40, %v566_v10  ;;  %v739_v13 = vmul.f32 %v1457_v40, %v606_v11 }
  0xbf   : > { %983 = vst.msk [vmem:[%s1473_s8 + $0x10] sm:$0xf] %vm978_vm3, %v918_v4  ;;  %v822_v14 = vadd.f32 %v1462_v41, %v754_v8  ;;  %v838_v15 = vadd.f32 %v1462_v41, %v770_v9 }
  0xc0   : > { %999 = vst.msk [vmem:[%s1473_s8 + $0x50] sm:$0xf] %vm978_vm3, %v934_v5  ;;  %v791_v16 = vadd.f32 %v1462_v41, %v723_v12  ;;  %v807_v17 = vadd.f32 %v1462_v41, %v739_v13 }
  0xc1   : > { %v886_v18 = vmax.f32 %v822_v14, 0.0  ;;  %v902_v19 = vmax.f32 %v838_v15, 0.0 }
  0xc2   : > { %v855_v20 = vmax.f32 %v791_v16, 0.0  ;;  %v871_v21 = vmax.f32 %v807_v17, 0.0 }
  0xc3   : > { %v950_v22 = vpack.c.bf16 %v886_v18, %v886_v18  ;;  %v966_v23 = vpack.c.bf16 %v902_v19, %v902_v19 }
  0xc4   : > { %v919_v24 = vpack.c.bf16 %v855_v20, %v855_v20  ;;  %v935_v25 = vpack.c.bf16 %v871_v21, %v871_v21  ;;  %v646_v26 = vpop.f32.mrf.mxu2  ;;  %v686_v27 = vpop.f32.mrf.mxu3 }
  0xc5   : > { %1015 = vst.msk [vmem:[%s1473_s8 + $0x90] sm:$0xf] %vm978_vm3, %v950_v22  ;;  %v755_v28 = vmul.f32 %v1457_v40, %v646_v26  ;;  %v771_v29 = vmul.f32 %v1457_v40, %v686_v27  ;;  %v569_v30 = vpop.f32.mrf.mxu0  ;;  %v609_v31 = vpop.f32.mrf.mxu1 }
  0xc6   : > { %1031 = vst.msk [vmem:[%s1473_s8 + $0xd0] sm:$0xf] %vm978_vm3, %v966_v23  ;;  %v724_v32 = vmul.f32 %v1457_v40, %v569_v30  ;;  %v740_v33 = vmul.f32 %v1457_v40, %v609_v31 }
  0xc7   : > { %984 = vst.msk [vmem:[%s1473_s8 + $0x14] sm:$0xf] %vm978_vm3, %v919_v24  ;;  %v823_v34 = vadd.f32 %v1462_v41, %v755_v28  ;;  %v839_v35 = vadd.f32 %v1462_v41, %v771_v29 }
  0xc8   : > { %1000 = vst.msk [vmem:[%s1473_s8 + $0x54] sm:$0xf] %vm978_vm3, %v935_v25  ;;  %v792_v36 = vadd.f32 %v1462_v41, %v724_v32  ;;  %v808_v37 = vadd.f32 %v1462_v41, %v740_v33 }
  0xc9   : > { %v887_v38 = vmax.f32 %v823_v34, 0.0  ;;  %v903_v39 = vmax.f32 %v839_v35, 0.0 }
  0xca   : > { %v856_v42 = vmax.f32 %v792_v36, 0.0  ;;  %v872_v43 = vmax.f32 %v808_v37, 0.0 }
  0xcb   : > { %v951_v44 = vpack.c.bf16 %v887_v38, %v887_v38  ;;  %v967_v45 = vpack.c.bf16 %v903_v39, %v903_v39 }
  0xcc   : > { %v920_v46 = vpack.c.bf16 %v856_v42, %v856_v42  ;;  %v936_v47 = vpack.c.bf16 %v872_v43, %v872_v43  ;;  %v649_v48 = vpop.f32.mrf.mxu2  ;;  %v689_v49 = vpop.f32.mrf.mxu3 }
  0xcd   : > { %1016 = vst.msk [vmem:[%s1473_s8 + $0x94] sm:$0xf] %vm978_vm3, %v951_v44  ;;  %v756_v50 = vmul.f32 %v1457_v40, %v649_v48  ;;  %v772_v51 = vmul.f32 %v1457_v40, %v689_v49  ;;  %v571_v52 = vpop.f32.mrf.mxu0  ;;  %v611_v53 = vpop.f32.mrf.mxu1 }
  0xce   : > { %1032 = vst.msk [vmem:[%s1473_s8 + $0xd4] sm:$0xf] %vm978_vm3, %v967_v45  ;;  %v725_v54 = vmul.f32 %v1457_v40, %v571_v52  ;;  %v741_v55 = vmul.f32 %v1457_v40, %v611_v53 }
  0xcf   : > { %985 = vst.msk [vmem:[%s1473_s8 + $0x18] sm:$0xf] %vm978_vm3, %v920_v46  ;;  %v824_v56 = vadd.f32 %v1462_v41, %v756_v50  ;;  %v840_v57 = vadd.f32 %v1462_v41, %v772_v51 }
  0xd0   : > { %1001 = vst.msk [vmem:[%s1473_s8 + $0x58] sm:$0xf] %vm978_vm3, %v936_v47  ;;  %v793_v58 = vadd.f32 %v1462_v41, %v725_v54  ;;  %v809_v59 = vadd.f32 %v1462_v41, %v741_v55 }
  0xd1   : > { %v888_v60 = vmax.f32 %v824_v56, 0.0  ;;  %v904_v61 = vmax.f32 %v840_v57, 0.0 }
  0xd2   : > { %v857_v62 = vmax.f32 %v793_v58, 0.0  ;;  %v873_v63 = vmax.f32 %v809_v59, 0.0 }
  0xd3   : > { %v952_v0 = vpack.c.bf16 %v888_v60, %v888_v60  ;;  %v968_v1 = vpack.c.bf16 %v904_v61, %v904_v61 }
  0xd4   : > { %v921_v2 = vpack.c.bf16 %v857_v62, %v857_v62  ;;  %v937_v3 = vpack.c.bf16 %v873_v63, %v873_v63  ;;  %v651_v4 = vpop.f32.mrf.mxu2  ;;  %v691_v5 = vpop.f32.mrf.mxu3 }
  0xd5   : > { %1017 = vst.msk [vmem:[%s1473_s8 + $0x98] sm:$0xf] %vm978_vm3, %v952_v0  ;;  %v757_v6 = vmul.f32 %v1457_v40, %v651_v4  ;;  %v773_v7 = vmul.f32 %v1457_v40, %v691_v5  ;;  %v574_v8 = vpop.f32.mrf.mxu0  ;;  %v614_v9 = vpop.f32.mrf.mxu1 }
  0xd6   : > { %1033 = vst.msk [vmem:[%s1473_s8 + $0xd8] sm:$0xf] %vm978_vm3, %v968_v1  ;;  %v726_v10 = vmul.f32 %v1457_v40, %v574_v8  ;;  %v742_v11 = vmul.f32 %v1457_v40, %v614_v9 }
  0xd7   : > { %986 = vst.msk [vmem:[%s1473_s8 + $0x1c] sm:$0xf] %vm978_vm3, %v921_v2  ;;  %v825_v12 = vadd.f32 %v1462_v41, %v757_v6  ;;  %v841_v13 = vadd.f32 %v1462_v41, %v773_v7 }
  0xd8   : > { %1002 = vst.msk [vmem:[%s1473_s8 + $0x5c] sm:$0xf] %vm978_vm3, %v937_v3  ;;  %v794_v14 = vadd.f32 %v1462_v41, %v726_v10  ;;  %v810_v15 = vadd.f32 %v1462_v41, %v742_v11 }
  0xd9   : > { %v889_v16 = vmax.f32 %v825_v12, 0.0  ;;  %v905_v17 = vmax.f32 %v841_v13, 0.0 }
  0xda   : > { %v858_v18 = vmax.f32 %v794_v14, 0.0  ;;  %v874_v19 = vmax.f32 %v810_v15, 0.0 }
  0xdb   : > { %v953_v20 = vpack.c.bf16 %v889_v16, %v889_v16  ;;  %v969_v21 = vpack.c.bf16 %v905_v17, %v905_v17 }
  0xdc   : > { %v922_v22 = vpack.c.bf16 %v858_v18, %v858_v18  ;;  %v938_v23 = vpack.c.bf16 %v874_v19, %v874_v19  ;;  %v654_v24 = vpop.f32.mrf.mxu2  ;;  %v694_v25 = vpop.f32.mrf.mxu3 }
  0xdd   : > { %1018 = vst.msk [vmem:[%s1473_s8 + $0x9c] sm:$0xf] %vm978_vm3, %v953_v20  ;;  %v758_v26 = vmul.f32 %v1457_v40, %v654_v24  ;;  %v774_v27 = vmul.f32 %v1457_v40, %v694_v25  ;;  %v576_v28 = vpop.f32.mrf.mxu0  ;;  %v616_v29 = vpop.f32.mrf.mxu1 }
  0xde   : > { %1034 = vst.msk [vmem:[%s1473_s8 + $0xdc] sm:$0xf] %vm978_vm3, %v969_v21  ;;  %v727_v30 = vmul.f32 %v1457_v40, %v576_v28  ;;  %v743_v31 = vmul.f32 %v1457_v40, %v616_v29 }
  0xdf   : > { %987 = vst.msk [vmem:[%s1473_s8 + $0x20] sm:$0xf] %vm978_vm3, %v922_v22  ;;  %v826_v32 = vadd.f32 %v1462_v41, %v758_v26  ;;  %v842_v33 = vadd.f32 %v1462_v41, %v774_v27 }
  0xe0   : > { %1003 = vst.msk [vmem:[%s1473_s8 + $0x60] sm:$0xf] %vm978_vm3, %v938_v23  ;;  %v795_v34 = vadd.f32 %v1462_v41, %v727_v30  ;;  %v811_v35 = vadd.f32 %v1462_v41, %v743_v31 }
  0xe1   : > { %v890_v36 = vmax.f32 %v826_v32, 0.0  ;;  %v906_v37 = vmax.f32 %v842_v33, 0.0 }
  0xe2   : > { %v859_v38 = vmax.f32 %v795_v34, 0.0  ;;  %v875_v39 = vmax.f32 %v811_v35, 0.0 }
  0xe3   : > { %v954_v42 = vpack.c.bf16 %v890_v36, %v890_v36  ;;  %v970_v43 = vpack.c.bf16 %v906_v37, %v906_v37 }
  0xe4   : > { %v923_v44 = vpack.c.bf16 %v859_v38, %v859_v38  ;;  %v939_v45 = vpack.c.bf16 %v875_v39, %v875_v39  ;;  %v656_v46 = vpop.f32.mrf.mxu2  ;;  %v696_v47 = vpop.f32.mrf.mxu3 }
  0xe5   : > { %1019 = vst.msk [vmem:[%s1473_s8 + $0xa0] sm:$0xf] %vm978_vm3, %v954_v42  ;;  %v759_v48 = vmul.f32 %v1457_v40, %v656_v46  ;;  %v775_v49 = vmul.f32 %v1457_v40, %v696_v47  ;;  %v579_v50 = vpop.f32.mrf.mxu0  ;;  %v619_v51 = vpop.f32.mrf.mxu1 }
  0xe6   : > { %1035 = vst.msk [vmem:[%s1473_s8 + $0xe0] sm:$0xf] %vm978_vm3, %v970_v43  ;;  %v728_v52 = vmul.f32 %v1457_v40, %v579_v50  ;;  %v744_v53 = vmul.f32 %v1457_v40, %v619_v51 }
  0xe7   : > { %988 = vst.msk [vmem:[%s1473_s8 + $0x24] sm:$0xf] %vm978_vm3, %v923_v44  ;;  %v827_v54 = vadd.f32 %v1462_v41, %v759_v48  ;;  %v843_v55 = vadd.f32 %v1462_v41, %v775_v49 }
  0xe8   : > { %1004 = vst.msk [vmem:[%s1473_s8 + $0x64] sm:$0xf] %vm978_vm3, %v939_v45  ;;  %v796_v56 = vadd.f32 %v1462_v41, %v728_v52  ;;  %v812_v57 = vadd.f32 %v1462_v41, %v744_v53 }
  0xe9   : > { %v891_v58 = vmax.f32 %v827_v54, 0.0  ;;  %v907_v59 = vmax.f32 %v843_v55, 0.0 }
  0xea   : > { %v860_v60 = vmax.f32 %v796_v56, 0.0  ;;  %v876_v61 = vmax.f32 %v812_v57, 0.0 }
  0xeb   : > { %v955_v62 = vpack.c.bf16 %v891_v58, %v891_v58  ;;  %v971_v63 = vpack.c.bf16 %v907_v59, %v907_v59 }
  0xec   : > { %v924_v0 = vpack.c.bf16 %v860_v60, %v860_v60  ;;  %v940_v1 = vpack.c.bf16 %v876_v61, %v876_v61  ;;  %v659_v2 = vpop.f32.mrf.mxu2  ;;  %v699_v3 = vpop.f32.mrf.mxu3 }
  0xed   : > { %1020 = vst.msk [vmem:[%s1473_s8 + $0xa4] sm:$0xf] %vm978_vm3, %v955_v62  ;;  %v760_v4 = vmul.f32 %v1457_v40, %v659_v2  ;;  %v776_v5 = vmul.f32 %v1457_v40, %v699_v3  ;;  %v581_v6 = vpop.f32.mrf.mxu0  ;;  %v621_v7 = vpop.f32.mrf.mxu1 }
  0xee   : > { %1036 = vst.msk [vmem:[%s1473_s8 + $0xe4] sm:$0xf] %vm978_vm3, %v971_v63  ;;  %v729_v8 = vmul.f32 %v1457_v40, %v581_v6  ;;  %v745_v9 = vmul.f32 %v1457_v40, %v621_v7 }
  0xef   : > { %989 = vst.msk [vmem:[%s1473_s8 + $0x28] sm:$0xf] %vm978_vm3, %v924_v0  ;;  %v828_v10 = vadd.f32 %v1462_v41, %v760_v4  ;;  %v844_v11 = vadd.f32 %v1462_v41, %v776_v5 }
  0xf0   : > { %1005 = vst.msk [vmem:[%s1473_s8 + $0x68] sm:$0xf] %vm978_vm3, %v940_v1  ;;  %v797_v12 = vadd.f32 %v1462_v41, %v729_v8  ;;  %v813_v13 = vadd.f32 %v1462_v41, %v745_v9 }
  0xf1   : > { %v892_v14 = vmax.f32 %v828_v10, 0.0  ;;  %v908_v15 = vmax.f32 %v844_v11, 0.0 }
  0xf2   : > { %v861_v16 = vmax.f32 %v797_v12, 0.0  ;;  %v877_v17 = vmax.f32 %v813_v13, 0.0 }
  0xf3   : > { %v956_v18 = vpack.c.bf16 %v892_v14, %v892_v14  ;;  %v972_v19 = vpack.c.bf16 %v908_v15, %v908_v15 }
  0xf4   : > { %v925_v20 = vpack.c.bf16 %v861_v16, %v861_v16  ;;  %v941_v21 = vpack.c.bf16 %v877_v17, %v877_v17  ;;  %v661_v22 = vpop.f32.mrf.mxu2  ;;  %v701_v23 = vpop.f32.mrf.mxu3 }
  0xf5   : > { %1021 = vst.msk [vmem:[%s1473_s8 + $0xa8] sm:$0xf] %vm978_vm3, %v956_v18  ;;  %v761_v24 = vmul.f32 %v1457_v40, %v661_v22  ;;  %v777_v25 = vmul.f32 %v1457_v40, %v701_v23  ;;  %v584_v26 = vpop.f32.mrf.mxu0  ;;  %v624_v27 = vpop.f32.mrf.mxu1 }
  0xf6   : > { %1037 = vst.msk [vmem:[%s1473_s8 + $0xe8] sm:$0xf] %vm978_vm3, %v972_v19  ;;  %v730_v28 = vmul.f32 %v1457_v40, %v584_v26  ;;  %v746_v29 = vmul.f32 %v1457_v40, %v624_v27 }
  0xf7   : > { %990 = vst.msk [vmem:[%s1473_s8 + $0x2c] sm:$0xf] %vm978_vm3, %v925_v20  ;;  %v829_v30 = vadd.f32 %v1462_v41, %v761_v24  ;;  %v845_v31 = vadd.f32 %v1462_v41, %v777_v25 }
  0xf8   : > { %1006 = vst.msk [vmem:[%s1473_s8 + $0x6c] sm:$0xf] %vm978_vm3, %v941_v21  ;;  %v798_v32 = vadd.f32 %v1462_v41, %v730_v28  ;;  %v814_v33 = vadd.f32 %v1462_v41, %v746_v29 }
  0xf9   : > { %v893_v34 = vmax.f32 %v829_v30, 0.0  ;;  %v909_v35 = vmax.f32 %v845_v31, 0.0 }
  0xfa   : > { %v862_v36 = vmax.f32 %v798_v32, 0.0  ;;  %v878_v37 = vmax.f32 %v814_v33, 0.0 }
  0xfb   : > { %v957_v38 = vpack.c.bf16 %v893_v34, %v893_v34  ;;  %v973_v39 = vpack.c.bf16 %v909_v35, %v909_v35 }
  0xfc   : > { %v926_v42 = vpack.c.bf16 %v862_v36, %v862_v36  ;;  %v942_v43 = vpack.c.bf16 %v878_v37, %v878_v37  ;;  %v664_v44 = vpop.f32.mrf.mxu2  ;;  %v704_v45 = vpop.f32.mrf.mxu3 }
  0xfd   : > { %1022 = vst.msk [vmem:[%s1473_s8 + $0xac] sm:$0xf] %vm978_vm3, %v957_v38  ;;  %v762_v46 = vmul.f32 %v1457_v40, %v664_v44  ;;  %v778_v47 = vmul.f32 %v1457_v40, %v704_v45  ;;  %v586_v48 = vpop.f32.mrf.mxu0  ;;  %v626_v49 = vpop.f32.mrf.mxu1 }
  0xfe   : > { %1038 = vst.msk [vmem:[%s1473_s8 + $0xec] sm:$0xf] %vm978_vm3, %v973_v39  ;;  %v731_v50 = vmul.f32 %v1457_v40, %v586_v48  ;;  %v747_v51 = vmul.f32 %v1457_v40, %v626_v49 }
  0xff   : > { %991 = vst.msk [vmem:[%s1473_s8 + $0x30] sm:$0xf] %vm978_vm3, %v926_v42  ;;  %v830_v52 = vadd.f32 %v1462_v41, %v762_v46  ;;  %v846_v53 = vadd.f32 %v1462_v41, %v778_v47 }
 0x100   : > { %1007 = vst.msk [vmem:[%s1473_s8 + $0x70] sm:$0xf] %vm978_vm3, %v942_v43  ;;  %v799_v54 = vadd.f32 %v1462_v41, %v731_v50  ;;  %v815_v55 = vadd.f32 %v1462_v41, %v747_v51 }
 0x101   : > { %v894_v56 = vmax.f32 %v830_v52, 0.0  ;;  %v910_v57 = vmax.f32 %v846_v53, 0.0 }
 0x102   : > { %v863_v58 = vmax.f32 %v799_v54, 0.0  ;;  %v879_v59 = vmax.f32 %v815_v55, 0.0 }
 0x103   : > { %v958_v60 = vpack.c.bf16 %v894_v56, %v894_v56  ;;  %v974_v61 = vpack.c.bf16 %v910_v57, %v910_v57 }
 0x104   : > { %v927_v62 = vpack.c.bf16 %v863_v58, %v863_v58  ;;  %v943_v63 = vpack.c.bf16 %v879_v59, %v879_v59  ;;  %v666_v0 = vpop.f32.mrf.mxu2  ;;  %v706_v1 = vpop.f32.mrf.mxu3 }
 0x105   : > { %1023 = vst.msk [vmem:[%s1473_s8 + $0xb0] sm:$0xf] %vm978_vm3, %v958_v60  ;;  %v763_v2 = vmul.f32 %v1457_v40, %v666_v0  ;;  %v779_v3 = vmul.f32 %v1457_v40, %v706_v1  ;;  %v589_v4 = vpop.f32.mrf.mxu0  ;;  %v629_v5 = vpop.f32.mrf.mxu1 }
 0x106   : > { %1039 = vst.msk [vmem:[%s1473_s8 + $0xf0] sm:$0xf] %vm978_vm3, %v974_v61  ;;  %v732_v6 = vmul.f32 %v1457_v40, %v589_v4  ;;  %v748_v7 = vmul.f32 %v1457_v40, %v629_v5 }
 0x107   : > { %992 = vst.msk [vmem:[%s1473_s8 + $0x34] sm:$0xf] %vm978_vm3, %v927_v62  ;;  %v831_v8 = vadd.f32 %v1462_v41, %v763_v2  ;;  %v847_v9 = vadd.f32 %v1462_v41, %v779_v3 }
 0x108   : > { %1008 = vst.msk [vmem:[%s1473_s8 + $0x74] sm:$0xf] %vm978_vm3, %v943_v63  ;;  %v800_v10 = vadd.f32 %v1462_v41, %v732_v6  ;;  %v816_v11 = vadd.f32 %v1462_v41, %v748_v7 }
 0x109   : > { %v895_v12 = vmax.f32 %v831_v8, 0.0  ;;  %v911_v13 = vmax.f32 %v847_v9, 0.0 }
 0x10a   : > { %v864_v14 = vmax.f32 %v800_v10, 0.0  ;;  %v880_v15 = vmax.f32 %v816_v11, 0.0 }
 0x10b   : > { %v959_v16 = vpack.c.bf16 %v895_v12, %v895_v12  ;;  %v975_v17 = vpack.c.bf16 %v911_v13, %v911_v13 }
 0x10c   : > { %v928_v18 = vpack.c.bf16 %v864_v14, %v864_v14  ;;  %v944_v19 = vpack.c.bf16 %v880_v15, %v880_v15  ;;  %v669_v20 = vpop.f32.mrf.mxu2  ;;  %v709_v21 = vpop.f32.mrf.mxu3 }
 0x10d   : > { %1024 = vst.msk [vmem:[%s1473_s8 + $0xb4] sm:$0xf] %vm978_vm3, %v959_v16  ;;  %v764_v22 = vmul.f32 %v1457_v40, %v669_v20  ;;  %v780_v23 = vmul.f32 %v1457_v40, %v709_v21  ;;  %v591_v24 = vpop.f32.mrf.mxu0  ;;  %v631_v25 = vpop.f32.mrf.mxu1 }
 0x10e   : > { %1040 = vst.msk [vmem:[%s1473_s8 + $0xf4] sm:$0xf] %vm978_vm3, %v975_v17  ;;  %v733_v26 = vmul.f32 %v1457_v40, %v591_v24  ;;  %v749_v27 = vmul.f32 %v1457_v40, %v631_v25 }
 0x10f   : > { %993 = vst.msk [vmem:[%s1473_s8 + $0x38] sm:$0xf] %vm978_vm3, %v928_v18  ;;  %v832_v28 = vadd.f32 %v1462_v41, %v764_v22  ;;  %v848_v29 = vadd.f32 %v1462_v41, %v780_v23 }
 0x110   : > { %1009 = vst.msk [vmem:[%s1473_s8 + $0x78] sm:$0xf] %vm978_vm3, %v944_v19  ;;  %v801_v30 = vadd.f32 %v1462_v41, %v733_v26  ;;  %v817_v31 = vadd.f32 %v1462_v41, %v749_v27 }
 0x111   : > { %v896_v32 = vmax.f32 %v832_v28, 0.0  ;;  %v912_v33 = vmax.f32 %v848_v29, 0.0 }
 0x112   : > { %v865_v34 = vmax.f32 %v801_v30, 0.0  ;;  %v881_v35 = vmax.f32 %v817_v31, 0.0 }
 0x113   : > { %v960_v36 = vpack.c.bf16 %v896_v32, %v896_v32  ;;  %v976_v37 = vpack.c.bf16 %v912_v33, %v912_v33 }
 0x114   : > { %v929_v38 = vpack.c.bf16 %v865_v34, %v865_v34  ;;  %v945_v39 = vpack.c.bf16 %v881_v35, %v881_v35  ;;  %v671_v42 = vpop.f32.mrf.mxu2  ;;  %v711_v43 = vpop.f32.mrf.mxu3 }
 0x115   : > { %1025 = vst.msk [vmem:[%s1473_s8 + $0xb8] sm:$0xf] %vm978_vm3, %v960_v36  ;;  %v765_v44 = vmul.f32 %v1457_v40, %v671_v42  ;;  %v781_v45 = vmul.f32 %v1457_v40, %v711_v43 }
 0x116   : > { %1041 = vst.msk [vmem:[%s1473_s8 + $0xf8] sm:$0xf] %vm978_vm3, %v976_v37 }
 0x117   : > { %994 = vst.msk [vmem:[%s1473_s8 + $0x3c] sm:$0xf] %vm978_vm3, %v929_v38  ;;  %v833_v46 = vadd.f32 %v1462_v41, %v765_v44  ;;  %v849_v47 = vadd.f32 %v1462_v41, %v781_v45 }
 0x118   : > { %1010 = vst.msk [vmem:[%s1473_s8 + $0x7c] sm:$0xf] %vm978_vm3, %v945_v39 }
 0x119   : > { %v897_v48 = vmax.f32 %v833_v46, 0.0  ;;  %v913_v49 = vmax.f32 %v849_v47, 0.0 }
 0x11b   : > { %v961_v50 = vpack.c.bf16 %v897_v48, %v897_v48  ;;  %v977_v51 = vpack.c.bf16 %v913_v49, %v913_v49 }
 0x11d   : > { %1026 = vst.msk [vmem:[%s1473_s8 + $0xbc] sm:$0xf] %vm978_vm3, %v961_v50 }
 0x11e   : > { %1042 = vst.msk [vmem:[%s1473_s8 + $0xfc] sm:$0xf] %vm978_vm3, %v977_v51 }
 0x11f PF: > { %s14_s15 = sadd.s32 1, %s1335_s15  }
 0x120   : > { %p11_p4 = scmp.ge.s32.totalorder %s14_s15, 18  }
 0x122   :  { %13 = sbr.rel (!%p11_p4) target bundleno = 1 (0x1), region = 66 }

</bundles_post_ra>
